<compile_context>
chip_gen: v6e
topology: v6e:2x2x1
jax: 0.10.0
libtpu: 0.0.40
codegen_flags: <defaults>
</compile_context>

<pallas_src>
import functools
import math

import jax
import jax.numpy as jnp
from jax.experimental import pallas as pl
from jax.experimental.pallas import tpu as pltpu


# --------------------------------------------------------------------------- #
# in-kernel helpers
# --------------------------------------------------------------------------- #
def _layer_norm(z, gamma, beta, eps=1e-6):
    # T2T LayerNorm: torch.std is unbiased (divisor H-1) and eps is added to std.
    h = z.shape[-1]
    mean = jnp.mean(z, axis=-1, keepdims=True)
    diff = z - mean
    var = jnp.sum(diff * diff, axis=-1, keepdims=True) * (1.0 / (h - 1))
    inv = pl.reciprocal(jnp.sqrt(var) + eps, approx=True)
    return gamma * diff * inv + beta


# --------------------------------------------------------------------------- #
# phase 1: pre-LN + multi-head self-attention + residual
#   grid = (batch, S // TQ); batch "parallel", seq-tile "arbitrary"
#   scratch: head-split bf16 Q/K/V caches filled once per batch element.
# --------------------------------------------------------------------------- #
def _attention_kernel(num_heads, x_ref, g_ref, b_ref, wq_ref, wk_ref, wv_ref,
                      wo3_ref, o_ref, qh_s, kh_s, vh_s):
    TQ = o_ref.shape[1]
    dk = kh_s.shape[2]
    dv = vh_s.shape[2]
    t = pl.program_id(1)

    # ---- per-batch cache fill: LN + Q/K/V projections, head-split, bf16 ----
    @pl.when(t == 0)
    def _():
        xn = _layer_norm(x_ref[0], g_ref[...], b_ref[...]).astype(jnp.bfloat16)
        # bf16 x bf16 -> f32 accumulate.  Query scale is folded into wq on host.
        q = jnp.dot(xn, wq_ref[...], preferred_element_type=jnp.float32)
        k = jnp.dot(xn, wk_ref[...], preferred_element_type=jnp.float32)
        v = jnp.dot(xn, wv_ref[...], preferred_element_type=jnp.float32)
        qb = q.astype(jnp.bfloat16)
        kb = k.astype(jnp.bfloat16)
        vb = v.astype(jnp.bfloat16)
        for h in range(num_heads):               # static; once per batch element
            qh_s[h] = qb[:, h * dk:(h + 1) * dk]
            kh_s[h] = kb[:, h * dk:(h + 1) * dk]
            vh_s[h] = vb[:, h * dv:(h + 1) * dv]

    # ---- per query tile: logits / softmax / context / output projection ----
    s0 = pl.multiple_of(t * TQ, TQ)
    qh = qh_s[:, pl.ds(s0, TQ), :]               # (nh, TQ, dk) bf16
    kh = kh_s[...]                               # (nh, S,  dk) bf16
    vh = vh_s[...]                               # (nh, S,  dv) bf16

    logits = jnp.einsum("hqd,hkd->hqk", qh, kh,
                        preferred_element_type=jnp.float32)   # (nh, TQ, S) f32
    m = jnp.max(logits, axis=-1, keepdims=True)
    e = jnp.exp(logits - m)
    w = e * pl.reciprocal(jnp.sum(e, axis=-1, keepdims=True), approx=True)

    ctx = jnp.einsum("hqk,hkd->hqd", w.astype(jnp.bfloat16), vh,
                     preferred_element_type=jnp.float32)      # (nh, TQ, dv) f32
    ctx_b = ctx.astype(jnp.bfloat16)

    # head merge folded into the output projection: y = sum_h ctx[h] @ wo[h]
    y = jnp.dot(ctx_b[0], wo3_ref[0], preferred_element_type=jnp.float32)
    for h in range(1, num_heads):
        y = y + jnp.dot(ctx_b[h], wo3_ref[h], preferred_element_type=jnp.float32)

    x_tile = x_ref[0, pl.ds(s0, TQ), :]          # residual rows (TQ, H) f32
    o_ref[0] = (x_tile + y).astype(o_ref.dtype)  # layer dropout = 0


# --------------------------------------------------------------------------- #
# phase 2: pre-LN + position-wise conv ('cc', k=3, padding='both') FFN + residual
#   grid = (batch, S // TF); tile + 8-row halo blocks only (no full-S residency)
# --------------------------------------------------------------------------- #
def _ffn_kernel(seq_len, xp_ref, xc_ref, xn_ref, g_ref, b_ref,
                w1_ref, b1c_ref, w2_ref, b2c_ref, o_ref):
    TF = xc_ref.shape[1]
    t = pl.program_id(1)
    s0 = pl.multiple_of(t * TF, TF)

    gamma, beta = g_ref[...], b_ref[...]
    xc = xc_ref[0]                               # (TF, H) f32 (tile + residual)

    # Window of TF + 4 rows covering seq rows [s0-2, s0+TF+2); halo rows come
    # from the neighbouring 8-row blocks (clamped at the ends, zero-masked).
    xw = jnp.concatenate([xp_ref[0, 6:8, :], xc, xn_ref[0, 0:2, :]], axis=0)

    xn_w = _layer_norm(xw, gamma, beta)          # (TF+4, H) f32
    idx_w = s0 - 2 + jax.lax.broadcasted_iota(jnp.int32, (TF + 4, 1), 0)
    in_range_w = jnp.logical_and(idx_w >= 0, idx_w < seq_len)
    xn_w = jnp.where(in_range_w, xn_w, 0.0).astype(jnp.bfloat16)   # conv zero-pad

    # conv1 for the tile AND both 1-row halos in ONE matmul:
    #   rows map to seq positions [s0-1, s0+TF+1)
    zcat = jnp.concatenate([xn_w[0:TF + 2], xn_w[1:TF + 3], xn_w[2:TF + 4]],
                           axis=-1)                               # (TF+2, 3H) bf16
    h1 = jnp.dot(zcat, w1_ref[...], preferred_element_type=jnp.float32)
    h1 = jnp.maximum(h1 + b1c_ref[...], 0.0)                      # (TF+2, F) f32
    idx_h = s0 - 1 + jax.lax.broadcasted_iota(jnp.int32, (TF + 2, 1), 0)
    in_range_h = jnp.logical_and(idx_h >= 0, idx_h < seq_len)
    h1 = jnp.where(in_range_h, h1, 0.0).astype(jnp.bfloat16)      # conv2 zero-pad

    # conv2 over the tile rows, taps [prev | center | next] of h1
    hcat = jnp.concatenate([h1[0:TF], h1[1:TF + 1], h1[2:TF + 2]], axis=-1)
    y2 = jnp.dot(hcat, w2_ref[...], preferred_element_type=jnp.float32)
    # NOTE: the reference PositionwiseFeedForward's `if i < len(self.layers)`
    # guard is always true, so ReLU is applied after the last conv as well.
    y2 = jnp.maximum(y2 + b2c_ref[...], 0.0)                      # (TF, H) f32

    o_ref[0] = (xc + y2).astype(o_ref.dtype)                      # layer dropout = 0


# --------------------------------------------------------------------------- #
# wrapper
# --------------------------------------------------------------------------- #
def _vmem_cap_bytes():
    try:
        return int(pltpu.get_tpu_info().vmem_capacity_bytes)
    except Exception:
        return 64 << 20                       # conservative (v7x-sized) fallback


def _vmem_limit_bytes(block_bytes, extra_bytes):
    # in/out blocks are double-buffered by BlockSpec; scratch + live values are
    # single-buffered.  Cap at ~60% of physical VMEM (≈38 MiB v7x, ≈76 MiB v6e).
    est = 2 * block_bytes + extra_bytes
    cap = int(0.6 * _vmem_cap_bytes())
    return int(min(max(int(est * 1.5) + (1 << 20), 16 << 20), cap))


def encoder_layer(x, params, *, num_heads, q_tile=None, f_tile=None):
    """x: (B, S, H) float32.

    params (PyTorch-equivalent layout, all float32):
      g1, b1, g2, b2 : (H,)          LayerNorm gamma/beta
      wq, wk, wv     : (H, Kd/Vd)    nn.Linear(bias=False) weight, pre-transposed
      wo             : (Vd, H)
      c1w            : (3, H, F)     Conv1d weight (Cout, Cin, 3) repacked as
      c2w            : (3, F, H)       taps [prev, center, next] x (Cin, Cout)
      c1b, c2b       : (F,), (H,)    Conv1d biases
    """
    (g1, b1, wq, wk, wv, wo, g2, b2, c1w, c1b, c2w, c2b) = params
    B, S, H = x.shape
    Kd, Vd, F = wq.shape[1], wv.shape[1], c1w.shape[2]
    dk, dv = Kd // num_heads, Vd // num_heads

    cap = _vmem_cap_bytes()
    default_tile = 512 if cap >= (96 << 20) else 256    # bigger tiles on 128 MiB parts
    TQ = q_tile if q_tile is not None else min(S, default_tile)
    TF = f_tile if f_tile is not None else min(S, default_tile)
    assert S % TQ == 0 and S % TF == 0
    assert S % 8 == 0 and TQ % 8 == 0 and TF % 8 == 0

    # Host-side weight prep: fold the query scale, cast matmul weights to bf16,
    # concatenate conv taps along the contraction dim, head-split wo.
    wq_b = (wq * (dk ** -0.5)).astype(jnp.bfloat16)
    wk_b = wk.astype(jnp.bfloat16)
    wv_b = wv.astype(jnp.bfloat16)
    wo3_b = wo.reshape(num_heads, dv, H).astype(jnp.bfloat16)
    w1_b = c1w.reshape(3 * H, F).astype(jnp.bfloat16)   # [Wprev; Wcenter; Wnext]
    w2_b = c2w.reshape(3 * F, H).astype(jnp.bfloat16)
    g1r, b1r = g1.reshape(1, H), b1.reshape(1, H)
    g2r, b2r = g2.reshape(1, H), b2.reshape(1, H)
    c1br, c2br = c1b.reshape(1, F), c2b.reshape(1, H)

    f32, bf16 = jnp.float32, jnp.bfloat16
    nbytes = lambda shape, dt: math.prod(shape) * jnp.dtype(dt).itemsize

    # ------------------------------ attention ------------------------------ #
    attn_blocks = (nbytes((1, S, H), f32) + nbytes((1, TQ, H), f32)
                   + 2 * nbytes((1, H), f32)
                   + 2 * nbytes((H, Kd), bf16) + nbytes((H, Vd), bf16)
                   + nbytes((num_heads, dv, H), bf16))
    attn_extra = (2 * nbytes((num_heads, S, dk), bf16)
                  + nbytes((num_heads, S, dv), bf16)
                  + nbytes((S, H), f32) + nbytes((S, H), bf16)
                  + 3 * nbytes((S, Kd), f32)
                  + 3 * nbytes((num_heads, TQ, S), f32)
                  + 2 * nbytes((num_heads, TQ, dv), f32)
                  + 3 * nbytes((TQ, H), f32))

    x1 = pl.pallas_call(
        functools.partial(_attention_kernel, num_heads),
        grid=(B, S // TQ),
        in_specs=[
            pl.BlockSpec((1, S, H), lambda b, t: (b, 0, 0)),     # full seq (K/V + residual)
            pl.BlockSpec((1, H), lambda b, t: (0, 0)),           # gamma
            pl.BlockSpec((1, H), lambda b, t: (0, 0)),           # beta
            pl.BlockSpec((H, Kd), lambda b, t: (0, 0)),          # wq (scaled)
            pl.BlockSpec((H, Kd), lambda b, t: (0, 0)),          # wk
            pl.BlockSpec((H, Vd), lambda b, t: (0, 0)),          # wv
            pl.BlockSpec((num_heads, dv, H), lambda b, t: (0, 0, 0)),  # wo, head-split
        ],
        out_specs=pl.BlockSpec((1, TQ, H), lambda b, t: (b, t, 0)),
        out_shape=jax.ShapeDtypeStruct((B, S, H), jnp.float32),
        scratch_shapes=[
            pltpu.VMEM((num_heads, S, dk), jnp.bfloat16),        # Q cache
            pltpu.VMEM((num_heads, S, dk), jnp.bfloat16),        # K cache
            pltpu.VMEM((num_heads, S, dv), jnp.bfloat16),        # V cache
        ],
        compiler_params=pltpu.CompilerParams(
            dimension_semantics=("parallel", "arbitrary"),
            vmem_limit_bytes=_vmem_limit_bytes(attn_blocks, attn_extra)),
    )(x, g1r, b1r, wq_b, wk_b, wv_b, wo3_b)

    # ------------------------------ conv FFN ------------------------------- #
    nt = S // TF
    S8 = S // 8
    TB = TF // 8   # seq-tile size measured in 8-row halo blocks

    ffn_blocks = (2 * nbytes((1, 8, H), f32) + 2 * nbytes((1, TF, H), f32)
                  + 2 * nbytes((1, H), f32)
                  + nbytes((3 * H, F), bf16) + nbytes((1, F), f32)
                  + nbytes((3 * F, H), bf16) + nbytes((1, H), f32))
    ffn_extra = (3 * nbytes((TF + 4, H), f32) + nbytes((TF + 2, 3 * H), bf16)
                 + 2 * nbytes((TF + 2, F), f32) + nbytes((TF, 3 * F), bf16)
                 + 3 * nbytes((TF, H), f32))

    out = pl.pallas_call(
        functools.partial(_ffn_kernel, S),
        grid=(B, nt),
        in_specs=[
            # previous 8-row halo block (clamped at t == 0, zero-masked in-kernel)
            pl.BlockSpec((1, 8, H), lambda b, t: (b, jnp.maximum(t * TB - 1, 0), 0)),
            # center tile (also the residual rows)
            pl.BlockSpec((1, TF, H), lambda b, t: (b, t, 0)),
            # next 8-row halo block (clamped at the last tile, zero-masked in-kernel)
            pl.BlockSpec((1, 8, H), lambda b, t: (b, jnp.minimum(t * TB + TB, S8 - 1), 0)),
            pl.BlockSpec((1, H), lambda b, t: (0, 0)),           # gamma
            pl.BlockSpec((1, H), lambda b, t: (0, 0)),           # beta
            pl.BlockSpec((3 * H, F), lambda b, t: (0, 0)),       # conv1 taps
            pl.BlockSpec((1, F), lambda b, t: (0, 0)),           # conv1 bias
            pl.BlockSpec((3 * F, H), lambda b, t: (0, 0)),       # conv2 taps
            pl.BlockSpec((1, H), lambda b, t: (0, 0)),           # conv2 bias
        ],
        out_specs=pl.BlockSpec((1, TF, H), lambda b, t: (b, t, 0)),
        out_shape=jax.ShapeDtypeStruct((B, S, H), jnp.float32),
        compiler_params=pltpu.CompilerParams(
            dimension_semantics=("parallel", "parallel"),
            vmem_limit_bytes=_vmem_limit_bytes(ffn_blocks, ffn_extra)),
    )(x1, x1, x1, g2r, b2r, w1_b, c1br, w2_b, c2br)

    return out


# --------------------------------------------------------------------------- #
# pure-JAX f32 reference (matches the PyTorch module in eval mode)
# --------------------------------------------------------------------------- #
def reference_encoder_layer(x, params, *, num_heads):
    (g1, b1, wq, wk, wv, wo, g2, b2, c1w, c1b, c2w, c2b) = params
    B, S, H = x.shape
    Kd, Vd = wq.shape[1], wv.shape[1]
    dk, dv = Kd // num_heads, Vd // num_heads
    eps = 1e-6

    def ln(z, g, b):
        mean = z.mean(-1, keepdims=True)
        diff = z - mean
        var = (diff * diff).sum(-1, keepdims=True) / (H - 1)   # torch.std: unbiased
        return g * diff / (jnp.sqrt(var) + eps) + b

    xn = ln(x, g1, b1)
    q = (xn @ wq) * dk ** -0.5
    k = xn @ wk
    v = xn @ wv
    qh = q.reshape(B, S, num_heads, dk).transpose(0, 2, 1, 3)
    kh = k.reshape(B, S, num_heads, dk).transpose(0, 2, 1, 3)
    vh = v.reshape(B, S, num_heads, dv).transpose(0, 2, 1, 3)
    w = jax.nn.softmax(jnp.einsum("bhqd,bhkd->bhqk", qh, kh), axis=-1)
    ctx = jnp.einsum("bhqk,bhkd->bhqd", w, vh)
    ctx = ctx.transpose(0, 2, 1, 3).reshape(B, S, Vd)
    x1 = x + ctx @ wo

    def conv3(z, w3, bias):     # k=3, padding='both', taps [prev, center, next]
        zp = jnp.pad(z, ((0, 0), (1, 0), (0, 0)))[:, :-1]
        zn = jnp.pad(z, ((0, 0), (0, 1), (0, 0)))[:, 1:]
        return zp @ w3[0] + z @ w3[1] + zn @ w3[2] + bias

    xn2 = ln(x1, g2, b2)
    h1 = jax.nn.relu(conv3(xn2, c1w, c1b))
    y2 = jax.nn.relu(conv3(h1, c2w, c2b))   # always-true guard -> ReLU after last conv
    return x1 + y2


# --------------------------------------------------------------------------- #
if __name__ == "__main__":
    # Small but lane/sublane-aligned shapes (head_dim = 128 lanes, H/F multiples
    # of 128, S and seq tiles multiples of 8).  Two sequence tiles per phase so
    # the cross-tile conv halo and the K/V-cache reuse paths are exercised.
    B, S = 2, 16
    H, NH = 128, 4
    Kd = Vd = 128 * NH        # head_dim = 128
    F = 256
    TQ = TF = 8

    key = jax.random.PRNGKey(0)
    ks = jax.random.split(key, 9)
    init = lambda k, shape: jax.random.normal(k, shape, jnp.float32) * 0.05

    x = jax.random.normal(ks[0], (B, S, H), jnp.float32)

    wq = init(ks[1], (H, Kd))
    wk = init(ks[2], (H, Kd))
    wv = init(ks[3], (H, Vd))
    wo = init(ks[4], (Vd, H))
    g1 = jnp.ones((H,), jnp.float32)
    b1 = jnp.zeros((H,), jnp.float32)
    g2 = jnp.ones((H,), jnp.float32)
    b2 = jnp.zeros((H,), jnp.float32)
    c1w = init(ks[5], (3, H, F))
    c1b = init(ks[6], (F,))
    c2w = init(ks[7], (3, F, H))
    c2b = init(ks[8], (H,))
    params = (g1, b1, wq, wk, wv, wo, g2, b2, c1w, c1b, c2w, c2b)

    out = encoder_layer(x, params, num_heads=NH, q_tile=TQ, f_tile=TF)
    out = jax.block_until_ready(out)
    assert out.shape == (B, S, H) and out.dtype == jnp.float32

    ref = reference_encoder_layer(x, params, num_heads=NH)
    rel_err = float(jnp.max(jnp.abs(out - ref)) / (jnp.max(jnp.abs(ref)) + 1e-6))
    assert rel_err < 5e-2, f"kernel/reference mismatch: rel_err={rel_err:.3e}"
    print("KERNEL_OK")
</pallas_src>

<mosaic_0001>
module attributes {stable_mosaic.version = 11 : i64} {
  func.func @_attention_kernel(%arg0: i32, %arg1: i32, %arg2: memref<1x16x128xf32, #tpu.memory_space<vmem>>, %arg3: memref<1x128xf32, #tpu.memory_space<vmem>>, %arg4: memref<1x128xf32, #tpu.memory_space<vmem>>, %arg5: memref<128x512xbf16, #tpu.memory_space<vmem>>, %arg6: memref<128x512xbf16, #tpu.memory_space<vmem>>, %arg7: memref<128x512xbf16, #tpu.memory_space<vmem>>, %arg8: memref<4x128x128xbf16, #tpu.memory_space<vmem>>, %arg9: memref<1x8x128xf32, #tpu.memory_space<vmem>>, %arg10: memref<4x16x128xbf16, #tpu.memory_space<vmem>>, %arg11: memref<4x16x128xbf16, #tpu.memory_space<vmem>>, %arg12: memref<4x16x128xbf16, #tpu.memory_space<vmem>>) attributes {dimension_semantics = [#tpu.dimension_semantics<parallel>, #tpu.dimension_semantics<arbitrary>], iteration_bounds = array<i64: 2, 2>, scalar_prefetch = 0 : i64, scratch_operands = 3 : i64, tpu.core_type = #tpu.core_type<tc>, window_params = [{transform_indices = @transform_0, window_bounds = array<i64: 1, 16, 128>}, {pipeline_mode = #tpu.pipeline_mode<synchronous>, transform_indices = @transform_1, window_bounds = array<i64: 1, 128>}, {pipeline_mode = #tpu.pipeline_mode<synchronous>, transform_indices = @transform_2, window_bounds = array<i64: 1, 128>}, {pipeline_mode = #tpu.pipeline_mode<synchronous>, transform_indices = @transform_3, window_bounds = array<i64: 128, 512>}, {pipeline_mode = #tpu.pipeline_mode<synchronous>, transform_indices = @transform_4, window_bounds = array<i64: 128, 512>}, {pipeline_mode = #tpu.pipeline_mode<synchronous>, transform_indices = @transform_5, window_bounds = array<i64: 128, 512>}, {pipeline_mode = #tpu.pipeline_mode<synchronous>, transform_indices = @transform_6, window_bounds = array<i64: 4, 128, 128>}, {transform_indices = @transform_7, window_bounds = array<i64: 1, 8, 128>}]} {
    %c0_i32 = arith.constant 0 : i32
    %0 = arith.cmpi eq, %arg1, %c0_i32 : i32
    %1 = arith.extui %0 : i1 to i32
    %c0_i32_0 = arith.constant 0 : i32
    %2 = arith.cmpi ne, %1, %c0_i32_0 : i32
    scf.if %2 {
      %c0_29 = arith.constant 0 : index
      %c0_30 = arith.constant 0 : index
      %c0_31 = arith.constant 0 : index
      %53 = vector.load %arg2[%c0_29, %c0_30, %c0_31] : memref<1x16x128xf32, #tpu.memory_space<vmem>>, vector<1x16x128xf32>
      %54 = vector.shape_cast %53 : vector<1x16x128xf32> to vector<16x128xf32>
      %c0_32 = arith.constant 0 : index
      %c0_33 = arith.constant 0 : index
      %55 = vector.load %arg3[%c0_32, %c0_33] : memref<1x128xf32, #tpu.memory_space<vmem>>, vector<1x128xf32>
      %c0_34 = arith.constant 0 : index
      %c0_35 = arith.constant 0 : index
      %56 = vector.load %arg4[%c0_34, %c0_35] : memref<1x128xf32, #tpu.memory_space<vmem>>, vector<1x128xf32>
      %cst_36 = arith.constant dense<0.000000e+00> : vector<16xf32>
      %57 = vector.multi_reduction <add>, %54, %cst_36 [1] : vector<16x128xf32> to vector<16xf32>
      %58 = vector.shape_cast %57 : vector<16xf32> to vector<16x1xf32>
      %cst_37 = arith.constant 1.280000e+02 : f32
      %59 = vector.broadcast %cst_37 : f32 to vector<16x1xf32>
      %60 = arith.divf %58, %59 : vector<16x1xf32>
      %61 = vector.broadcast %60 : vector<16x1xf32> to vector<16x128xf32>
      %62 = arith.subf %54, %61 : vector<16x128xf32>
      %63 = arith.mulf %62, %62 : vector<16x128xf32>
      %cst_38 = arith.constant dense<0.000000e+00> : vector<16xf32>
      %64 = vector.multi_reduction <add>, %63, %cst_38 [1] : vector<16x128xf32> to vector<16xf32>
      %65 = vector.shape_cast %64 : vector<16xf32> to vector<16x1xf32>
      %cst_39 = arith.constant 0.00787401571 : f32
      %66 = vector.broadcast %cst_39 : f32 to vector<16x1xf32>
      %67 = arith.mulf %65, %66 : vector<16x1xf32>
      %68 = math.sqrt %67 : vector<16x1xf32>
      %cst_40 = arith.constant 9.99999997E-7 : f32
      %69 = vector.broadcast %cst_40 : f32 to vector<16x1xf32>
      %70 = arith.addf %68, %69 : vector<16x1xf32>
      %71 = tpu.reciprocal %70 {approx = true} : vector<16x1xf32> -> vector<16x1xf32>
      %72 = vector.broadcast %55 : vector<1x128xf32> to vector<16x128xf32>
      %73 = arith.mulf %72, %62 : vector<16x128xf32>
      %74 = vector.broadcast %71 : vector<16x1xf32> to vector<16x128xf32>
      %75 = arith.mulf %73, %74 : vector<16x128xf32>
      %76 = vector.broadcast %56 : vector<1x128xf32> to vector<16x128xf32>
      %77 = arith.addf %75, %76 : vector<16x128xf32>
      %78 = arith.truncf %77 : vector<16x128xf32> to vector<16x128xbf16>
      %c0_41 = arith.constant 0 : index
      %c0_42 = arith.constant 0 : index
      %79 = vector.load %arg5[%c0_41, %c0_42] : memref<128x512xbf16, #tpu.memory_space<vmem>>, vector<128x512xbf16>
      %cst_43 = arith.constant dense<0.000000e+00> : vector<16x512xf32>
      %80 = tpu.matmul %78, %79, %cst_43 {dimension_numbers = #tpu.dot_dimension_numbers<[1], [0], [0], [1], [0, 0, 1, 1], [], []>} : vector<16x128xbf16>, vector<128x512xbf16>, vector<16x512xf32> -> vector<16x512xf32>
      %c0_44 = arith.constant 0 : index
      %c0_45 = arith.constant 0 : index
      %81 = vector.load %arg6[%c0_44, %c0_45] : memref<128x512xbf16, #tpu.memory_space<vmem>>, vector<128x512xbf16>
      %cst_46 = arith.constant dense<0.000000e+00> : vector<16x512xf32>
      %82 = tpu.matmul %78, %81, %cst_46 {dimension_numbers = #tpu.dot_dimension_numbers<[1], [0], [0], [1], [0, 0, 1, 1], [], []>} : vector<16x128xbf16>, vector<128x512xbf16>, vector<16x512xf32> -> vector<16x512xf32>
      %c0_47 = arith.constant 0 : index
      %c0_48 = arith.constant 0 : index
      %83 = vector.load %arg7[%c0_47, %c0_48] : memref<128x512xbf16, #tpu.memory_space<vmem>>, vector<128x512xbf16>
      %cst_49 = arith.constant dense<0.000000e+00> : vector<16x512xf32>
      %84 = tpu.matmul %78, %83, %cst_49 {dimension_numbers = #tpu.dot_dimension_numbers<[1], [0], [0], [1], [0, 0, 1, 1], [], []>} : vector<16x128xbf16>, vector<128x512xbf16>, vector<16x512xf32> -> vector<16x512xf32>
      %85 = arith.truncf %80 : vector<16x512xf32> to vector<16x512xbf16>
      %86 = arith.truncf %82 : vector<16x512xf32> to vector<16x512xbf16>
      %87 = arith.truncf %84 : vector<16x512xf32> to vector<16x512xbf16>
      %88 = vector.extract_strided_slice %85 {offsets = [0, 0], sizes = [16, 128], strides = [1, 1]} : vector<16x512xbf16> to vector<16x128xbf16>
      %c0_50 = arith.constant 0 : index
      %c0_51 = arith.constant 0 : index
      %c0_52 = arith.constant 0 : index
      %89 = vector.load %arg10[%c0_50, %c0_51, %c0_52] : memref<4x16x128xbf16, #tpu.memory_space<vmem>>, vector<1x16x128xbf16>
      %90 = vector.shape_cast %89 : vector<1x16x128xbf16> to vector<16x128xbf16>
      %91 = vector.shape_cast %88 : vector<16x128xbf16> to vector<1x16x128xbf16>
      tpu.vector_store %arg10[%c0_50, %c0_51, %c0_52], %91 {strides = array<i32>} : memref<4x16x128xbf16, #tpu.memory_space<vmem>>, vector<1x16x128xbf16>,
      %92 = vector.extract_strided_slice %86 {offsets = [0, 0], sizes = [16, 128], strides = [1, 1]} : vector<16x512xbf16> to vector<16x128xbf16>
      %c0_53 = arith.constant 0 : index
      %c0_54 = arith.constant 0 : index
      %c0_55 = arith.constant 0 : index
      %93 = vector.load %arg11[%c0_53, %c0_54, %c0_55] : memref<4x16x128xbf16, #tpu.memory_space<vmem>>, vector<1x16x128xbf16>
      %94 = vector.shape_cast %93 : vector<1x16x128xbf16> to vector<16x128xbf16>
      %95 = vector.shape_cast %92 : vector<16x128xbf16> to vector<1x16x128xbf16>
      tpu.vector_store %arg11[%c0_53, %c0_54, %c0_55], %95 {strides = array<i32>} : memref<4x16x128xbf16, #tpu.memory_space<vmem>>, vector<1x16x128xbf16>,
      %96 = vector.extract_strided_slice %87 {offsets = [0, 0], sizes = [16, 128], strides = [1, 1]} : vector<16x512xbf16> to vector<16x128xbf16>
      %c0_56 = arith.constant 0 : index
      %c0_57 = arith.constant 0 : index
      %c0_58 = arith.constant 0 : index
      %97 = vector.load %arg12[%c0_56, %c0_57, %c0_58] : memref<4x16x128xbf16, #tpu.memory_space<vmem>>, vector<1x16x128xbf16>
      %98 = vector.shape_cast %97 : vector<1x16x128xbf16> to vector<16x128xbf16>
      %99 = vector.shape_cast %96 : vector<16x128xbf16> to vector<1x16x128xbf16>
      tpu.vector_store %arg12[%c0_56, %c0_57, %c0_58], %99 {strides = array<i32>} : memref<4x16x128xbf16, #tpu.memory_space<vmem>>, vector<1x16x128xbf16>,
      %100 = vector.extract_strided_slice %85 {offsets = [0, 128], sizes = [16, 128], strides = [1, 1]} : vector<16x512xbf16> to vector<16x128xbf16>
      %c1_59 = arith.constant 1 : index
      %c0_60 = arith.constant 0 : index
      %c0_61 = arith.constant 0 : index
      %101 = vector.load %arg10[%c1_59, %c0_60, %c0_61] : memref<4x16x128xbf16, #tpu.memory_space<vmem>>, vector<1x16x128xbf16>
      %102 = vector.shape_cast %101 : vector<1x16x128xbf16> to vector<16x128xbf16>
      %103 = vector.shape_cast %100 : vector<16x128xbf16> to vector<1x16x128xbf16>
      tpu.vector_store %arg10[%c1_59, %c0_60, %c0_61], %103 {strides = array<i32>} : memref<4x16x128xbf16, #tpu.memory_space<vmem>>, vector<1x16x128xbf16>,
      %104 = vector.extract_strided_slice %86 {offsets = [0, 128], sizes = [16, 128], strides = [1, 1]} : vector<16x512xbf16> to vector<16x128xbf16>
      %c1_62 = arith.constant 1 : index
      %c0_63 = arith.constant 0 : index
      %c0_64 = arith.constant 0 : index
      %105 = vector.load %arg11[%c1_62, %c0_63, %c0_64] : memref<4x16x128xbf16, #tpu.memory_space<vmem>>, vector<1x16x128xbf16>
      %106 = vector.shape_cast %105 : vector<1x16x128xbf16> to vector<16x128xbf16>
      %107 = vector.shape_cast %104 : vector<16x128xbf16> to vector<1x16x128xbf16>
      tpu.vector_store %arg11[%c1_62, %c0_63, %c0_64], %107 {strides = array<i32>} : memref<4x16x128xbf16, #tpu.memory_space<vmem>>, vector<1x16x128xbf16>,
      %108 = vector.extract_strided_slice %87 {offsets = [0, 128], sizes = [16, 128], strides = [1, 1]} : vector<16x512xbf16> to vector<16x128xbf16>
      %c1_65 = arith.constant 1 : index
      %c0_66 = arith.constant 0 : index
      %c0_67 = arith.constant 0 : index
      %109 = vector.load %arg12[%c1_65, %c0_66, %c0_67] : memref<4x16x128xbf16, #tpu.memory_space<vmem>>, vector<1x16x128xbf16>
      %110 = vector.shape_cast %109 : vector<1x16x128xbf16> to vector<16x128xbf16>
      %111 = vector.shape_cast %108 : vector<16x128xbf16> to vector<1x16x128xbf16>
      tpu.vector_store %arg12[%c1_65, %c0_66, %c0_67], %111 {strides = array<i32>} : memref<4x16x128xbf16, #tpu.memory_space<vmem>>, vector<1x16x128xbf16>,
      %112 = vector.extract_strided_slice %85 {offsets = [0, 256], sizes = [16, 128], strides = [1, 1]} : vector<16x512xbf16> to vector<16x128xbf16>
      %c2_68 = arith.constant 2 : index
      %c0_69 = arith.constant 0 : index
      %c0_70 = arith.constant 0 : index
      %113 = vector.load %arg10[%c2_68, %c0_69, %c0_70] : memref<4x16x128xbf16, #tpu.memory_space<vmem>>, vector<1x16x128xbf16>
      %114 = vector.shape_cast %113 : vector<1x16x128xbf16> to vector<16x128xbf16>
      %115 = vector.shape_cast %112 : vector<16x128xbf16> to vector<1x16x128xbf16>
      tpu.vector_store %arg10[%c2_68, %c0_69, %c0_70], %115 {strides = array<i32>} : memref<4x16x128xbf16, #tpu.memory_space<vmem>>, vector<1x16x128xbf16>,
      %116 = vector.extract_strided_slice %86 {offsets = [0, 256], sizes = [16, 128], strides = [1, 1]} : vector<16x512xbf16> to vector<16x128xbf16>
      %c2_71 = arith.constant 2 : index
      %c0_72 = arith.constant 0 : index
      %c0_73 = arith.constant 0 : index
      %117 = vector.load %arg11[%c2_71, %c0_72, %c0_73] : memref<4x16x128xbf16, #tpu.memory_space<vmem>>, vector<1x16x128xbf16>
      %118 = vector.shape_cast %117 : vector<1x16x128xbf16> to vector<16x128xbf16>
      %119 = vector.shape_cast %116 : vector<16x128xbf16> to vector<1x16x128xbf16>
      tpu.vector_store %arg11[%c2_71, %c0_72, %c0_73], %119 {strides = array<i32>} : memref<4x16x128xbf16, #tpu.memory_space<vmem>>, vector<1x16x128xbf16>,
      %120 = vector.extract_strided_slice %87 {offsets = [0, 256], sizes = [16, 128], strides = [1, 1]} : vector<16x512xbf16> to vector<16x128xbf16>
      %c2_74 = arith.constant 2 : index
      %c0_75 = arith.constant 0 : index
      %c0_76 = arith.constant 0 : index
      %121 = vector.load %arg12[%c2_74, %c0_75, %c0_76] : memref<4x16x128xbf16, #tpu.memory_space<vmem>>, vector<1x16x128xbf16>
      %122 = vector.shape_cast %121 : vector<1x16x128xbf16> to vector<16x128xbf16>
      %123 = vector.shape_cast %120 : vector<16x128xbf16> to vector<1x16x128xbf16>
      tpu.vector_store %arg12[%c2_74, %c0_75, %c0_76], %123 {strides = array<i32>} : memref<4x16x128xbf16, #tpu.memory_space<vmem>>, vector<1x16x128xbf16>,
      %124 = vector.extract_strided_slice %85 {offsets = [0, 384], sizes = [16, 128], strides = [1, 1]} : vector<16x512xbf16> to vector<16x128xbf16>
      %c3_77 = arith.constant 3 : index
      %c0_78 = arith.constant 0 : index
      %c0_79 = arith.constant 0 : index
      %125 = vector.load %arg10[%c3_77, %c0_78, %c0_79] : memref<4x16x128xbf16, #tpu.memory_space<vmem>>, vector<1x16x128xbf16>
      %126 = vector.shape_cast %125 : vector<1x16x128xbf16> to vector<16x128xbf16>
      %127 = vector.shape_cast %124 : vector<16x128xbf16> to vector<1x16x128xbf16>
      tpu.vector_store %arg10[%c3_77, %c0_78, %c0_79], %127 {strides = array<i32>} : memref<4x16x128xbf16, #tpu.memory_space<vmem>>, vector<1x16x128xbf16>,
      %128 = vector.extract_strided_slice %86 {offsets = [0, 384], sizes = [16, 128], strides = [1, 1]} : vector<16x512xbf16> to vector<16x128xbf16>
      %c3_80 = arith.constant 3 : index
      %c0_81 = arith.constant 0 : index
      %c0_82 = arith.constant 0 : index
      %129 = vector.load %arg11[%c3_80, %c0_81, %c0_82] : memref<4x16x128xbf16, #tpu.memory_space<vmem>>, vector<1x16x128xbf16>
      %130 = vector.shape_cast %129 : vector<1x16x128xbf16> to vector<16x128xbf16>
      %131 = vector.shape_cast %128 : vector<16x128xbf16> to vector<1x16x128xbf16>
      tpu.vector_store %arg11[%c3_80, %c0_81, %c0_82], %131 {strides = array<i32>} : memref<4x16x128xbf16, #tpu.memory_space<vmem>>, vector<1x16x128xbf16>,
      %132 = vector.extract_strided_slice %87 {offsets = [0, 384], sizes = [16, 128], strides = [1, 1]} : vector<16x512xbf16> to vector<16x128xbf16>
      %c3_83 = arith.constant 3 : index
      %c0_84 = arith.constant 0 : index
      %c0_85 = arith.constant 0 : index
      %133 = vector.load %arg12[%c3_83, %c0_84, %c0_85] : memref<4x16x128xbf16, #tpu.memory_space<vmem>>, vector<1x16x128xbf16>
      %134 = vector.shape_cast %133 : vector<1x16x128xbf16> to vector<16x128xbf16>
      %135 = vector.shape_cast %132 : vector<16x128xbf16> to vector<1x16x128xbf16>
      tpu.vector_store %arg12[%c3_83, %c0_84, %c0_85], %135 {strides = array<i32>} : memref<4x16x128xbf16, #tpu.memory_space<vmem>>, vector<1x16x128xbf16>,
    } else {
    }
    %c8_i32 = arith.constant 8 : i32
    %3 = arith.muli %arg1, %c8_i32 : i32
    %4 = tpu.assume_multiple %3, 8 : i32
    %c0 = arith.constant 0 : index
    %5 = arith.index_cast %4 : i32 to index
    %c0_1 = arith.constant 0 : index
    %6 = vector.load %arg10[%c0, %5, %c0_1] : memref<4x16x128xbf16, #tpu.memory_space<vmem>>, vector<4x8x128xbf16>
    %c0_2 = arith.constant 0 : index
    %c0_3 = arith.constant 0 : index
    %c0_4 = arith.constant 0 : index
    %7 = vector.load %arg11[%c0_2, %c0_3, %c0_4] : memref<4x16x128xbf16, #tpu.memory_space<vmem>>, vector<4x16x128xbf16>
    %c0_5 = arith.constant 0 : index
    %c0_6 = arith.constant 0 : index
    %c0_7 = arith.constant 0 : index
    %8 = vector.load %arg12[%c0_5, %c0_6, %c0_7] : memref<4x16x128xbf16, #tpu.memory_space<vmem>>, vector<4x16x128xbf16>
    "tpu.trace_start"() <{level = 10 : i32, message = "hqd,hkd->hqk"}> : () -> ()
    %cst = arith.constant dense<0.000000e+00> : vector<4x8x16xf32>
    %9 = tpu.matmul %6, %7, %cst {dimension_numbers = #tpu.dot_dimension_numbers<[2], [2], [1], [1], [0, 0, 0, 1, 1, 1], [0], [0]>} : vector<4x8x128xbf16>, vector<4x16x128xbf16>, vector<4x8x16xf32> -> vector<4x8x16xf32>
    "tpu.trace_stop"() : () -> ()
    %cst_8 = arith.constant dense<0xFF800000> : vector<4x8xf32>
    %10 = vector.multi_reduction <maximumf>, %9, %cst_8 [2] : vector<4x8x16xf32> to vector<4x8xf32>
    %11 = vector.shape_cast %10 : vector<4x8xf32> to vector<4x8x1xf32>
    %12 = vector.broadcast %11 : vector<4x8x1xf32> to vector<4x8x16xf32>
    %13 = arith.subf %9, %12 : vector<4x8x16xf32>
    %14 = math.exp %13 : vector<4x8x16xf32>
    %cst_9 = arith.constant dense<0.000000e+00> : vector<4x8xf32>
    %15 = vector.multi_reduction <add>, %14, %cst_9 [2] : vector<4x8x16xf32> to vector<4x8xf32>
    %16 = vector.shape_cast %15 : vector<4x8xf32> to vector<4x8x1xf32>
    %17 = tpu.reciprocal %16 {approx = true} : vector<4x8x1xf32> -> vector<4x8x1xf32>
    %18 = vector.broadcast %17 : vector<4x8x1xf32> to vector<4x8x16xf32>
    %19 = arith.mulf %14, %18 : vector<4x8x16xf32>
    %20 = arith.truncf %19 : vector<4x8x16xf32> to vector<4x8x16xbf16>
    "tpu.trace_start"() <{level = 10 : i32, message = "hqk,hkd->hqd"}> : () -> ()
    %cst_10 = arith.constant dense<0.000000e+00> : vector<4x8x128xf32>
    %21 = tpu.matmul %20, %8, %cst_10 {dimension_numbers = #tpu.dot_dimension_numbers<[2], [1], [1], [2], [0, 0, 0, 1, 1, 2], [0], [0]>} : vector<4x8x16xbf16>, vector<4x16x128xbf16>, vector<4x8x128xf32> -> vector<4x8x128xf32>
    "tpu.trace_stop"() : () -> ()
    %22 = arith.truncf %21 : vector<4x8x128xf32> to vector<4x8x128xbf16>
    %23 = vector.extract_strided_slice %22 {offsets = [0, 0, 0], sizes = [1, 8, 128], strides = [1, 1, 1]} : vector<4x8x128xbf16> to vector<1x8x128xbf16>
    %24 = vector.shape_cast %23 : vector<1x8x128xbf16> to vector<8x128xbf16>
    %c0_11 = arith.constant 0 : index
    %c0_12 = arith.constant 0 : index
    %c0_13 = arith.constant 0 : index
    %25 = vector.load %arg8[%c0_11, %c0_12, %c0_13] : memref<4x128x128xbf16, #tpu.memory_space<vmem>>, vector<1x128x128xbf16>
    %26 = vector.shape_cast %25 : vector<1x128x128xbf16> to vector<128x128xbf16>
    %cst_14 = arith.constant dense<0.000000e+00> : vector<8x128xf32>
    %27 = tpu.matmul %24, %26, %cst_14 {dimension_numbers = #tpu.dot_dimension_numbers<[1], [0], [0], [1], [0, 0, 1, 1], [], []>} : vector<8x128xbf16>, vector<128x128xbf16>, vector<8x128xf32> -> vector<8x128xf32>
    %28 = vector.extract_strided_slice %22 {offsets = [1, 0, 0], sizes = [1, 8, 128], strides = [1, 1, 1]} : vector<4x8x128xbf16> to vector<1x8x128xbf16>
    %29 = vector.shape_cast %28 : vector<1x8x128xbf16> to vector<8x128xbf16>
    %c1 = arith.constant 1 : index
    %c0_15 = arith.constant 0 : index
    %c0_16 = arith.constant 0 : index
    %30 = vector.load %arg8[%c1, %c0_15, %c0_16] : memref<4x128x128xbf16, #tpu.memory_space<vmem>>, vector<1x128x128xbf16>
    %31 = vector.shape_cast %30 : vector<1x128x128xbf16> to vector<128x128xbf16>
    %cst_17 = arith.constant dense<0.000000e+00> : vector<8x128xf32>
    %32 = tpu.matmul %29, %31, %cst_17 {dimension_numbers = #tpu.dot_dimension_numbers<[1], [0], [0], [1], [0, 0, 1, 1], [], []>} : vector<8x128xbf16>, vector<128x128xbf16>, vector<8x128xf32> -> vector<8x128xf32>
    %33 = arith.addf %27, %32 : vector<8x128xf32>
    %34 = vector.extract_strided_slice %22 {offsets = [2, 0, 0], sizes = [1, 8, 128], strides = [1, 1, 1]} : vector<4x8x128xbf16> to vector<1x8x128xbf16>
    %35 = vector.shape_cast %34 : vector<1x8x128xbf16> to vector<8x128xbf16>
    %c2 = arith.constant 2 : index
    %c0_18 = arith.constant 0 : index
    %c0_19 = arith.constant 0 : index
    %36 = vector.load %arg8[%c2, %c0_18, %c0_19] : memref<4x128x128xbf16, #tpu.memory_space<vmem>>, vector<1x128x128xbf16>
    %37 = vector.shape_cast %36 : vector<1x128x128xbf16> to vector<128x128xbf16>
    %cst_20 = arith.constant dense<0.000000e+00> : vector<8x128xf32>
    %38 = tpu.matmul %35, %37, %cst_20 {dimension_numbers = #tpu.dot_dimension_numbers<[1], [0], [0], [1], [0, 0, 1, 1], [], []>} : vector<8x128xbf16>, vector<128x128xbf16>, vector<8x128xf32> -> vector<8x128xf32>
    %39 = arith.addf %33, %38 : vector<8x128xf32>
    %40 = vector.extract_strided_slice %22 {offsets = [3, 0, 0], sizes = [1, 8, 128], strides = [1, 1, 1]} : vector<4x8x128xbf16> to vector<1x8x128xbf16>
    %41 = vector.shape_cast %40 : vector<1x8x128xbf16> to vector<8x128xbf16>
    %c3 = arith.constant 3 : index
    %c0_21 = arith.constant 0 : index
    %c0_22 = arith.constant 0 : index
    %42 = vector.load %arg8[%c3, %c0_21, %c0_22] : memref<4x128x128xbf16, #tpu.memory_space<vmem>>, vector<1x128x128xbf16>
    %43 = vector.shape_cast %42 : vector<1x128x128xbf16> to vector<128x128xbf16>
    %cst_23 = arith.constant dense<0.000000e+00> : vector<8x128xf32>
    %44 = tpu.matmul %41, %43, %cst_23 {dimension_numbers = #tpu.dot_dimension_numbers<[1], [0], [0], [1], [0, 0, 1, 1], [], []>} : vector<8x128xbf16>, vector<128x128xbf16>, vector<8x128xf32> -> vector<8x128xf32>
    %45 = arith.addf %39, %44 : vector<8x128xf32>
    %c0_24 = arith.constant 0 : index
    %46 = arith.index_cast %4 : i32 to index
    %c0_25 = arith.constant 0 : index
    %47 = vector.load %arg2[%c0_24, %46, %c0_25] : memref<1x16x128xf32, #tpu.memory_space<vmem>>, vector<1x8x128xf32>
    %48 = vector.shape_cast %47 : vector<1x8x128xf32> to vector<8x128xf32>
    %49 = arith.addf %48, %45 : vector<8x128xf32>
    %c0_26 = arith.constant 0 : index
    %c0_27 = arith.constant 0 : index
    %c0_28 = arith.constant 0 : index
    %50 = vector.load %arg9[%c0_26, %c0_27, %c0_28] : memref<1x8x128xf32, #tpu.memory_space<vmem>>, vector<1x8x128xf32>
    %51 = vector.shape_cast %50 : vector<1x8x128xf32> to vector<8x128xf32>
    %52 = vector.shape_cast %49 : vector<8x128xf32> to vector<1x8x128xf32>
    tpu.vector_store %arg9[%c0_26, %c0_27, %c0_28], %52 {strides = array<i32>} : memref<1x8x128xf32, #tpu.memory_space<vmem>>, vector<1x8x128xf32>,
    return
  }
  func.func @transform_0(%arg0: i32, %arg1: i32) -> (i32, i32, i32) {
    %c0_i32 = arith.constant 0 : i32
    %c0_i32_0 = arith.constant 0 : i32
    %c0_i32_1 = arith.constant 0 : i32
    return %arg0, %c0_i32, %c0_i32_0 : i32, i32, i32
  }
  func.func @transform_1(%arg0: i32, %arg1: i32) -> (i32, i32) {
    %c0_i32 = arith.constant 0 : i32
    %c0_i32_0 = arith.constant 0 : i32
    %c0_i32_1 = arith.constant 0 : i32
    return %c0_i32, %c0_i32_0 : i32, i32
  }
  func.func @transform_2(%arg0: i32, %arg1: i32) -> (i32, i32) {
    %c0_i32 = arith.constant 0 : i32
    %c0_i32_0 = arith.constant 0 : i32
    %c0_i32_1 = arith.constant 0 : i32
    return %c0_i32, %c0_i32_0 : i32, i32
  }
  func.func @transform_3(%arg0: i32, %arg1: i32) -> (i32, i32) {
    %c0_i32 = arith.constant 0 : i32
    %c0_i32_0 = arith.constant 0 : i32
    %c0_i32_1 = arith.constant 0 : i32
    return %c0_i32, %c0_i32_0 : i32, i32
  }
  func.func @transform_4(%arg0: i32, %arg1: i32) -> (i32, i32) {
    %c0_i32 = arith.constant 0 : i32
    %c0_i32_0 = arith.constant 0 : i32
    %c0_i32_1 = arith.constant 0 : i32
    return %c0_i32, %c0_i32_0 : i32, i32
  }
  func.func @transform_5(%arg0: i32, %arg1: i32) -> (i32, i32) {
    %c0_i32 = arith.constant 0 : i32
    %c0_i32_0 = arith.constant 0 : i32
    %c0_i32_1 = arith.constant 0 : i32
    return %c0_i32, %c0_i32_0 : i32, i32
  }
  func.func @transform_6(%arg0: i32, %arg1: i32) -> (i32, i32, i32) {
    %c0_i32 = arith.constant 0 : i32
    %c0_i32_0 = arith.constant 0 : i32
    %c0_i32_1 = arith.constant 0 : i32
    %c0_i32_2 = arith.constant 0 : i32
    return %c0_i32, %c0_i32_0, %c0_i32_1 : i32, i32, i32
  }
  func.func @transform_7(%arg0: i32, %arg1: i32) -> (i32, i32, i32) {
    %c0_i32 = arith.constant 0 : i32
    %c0_i32_0 = arith.constant 0 : i32
    return %arg0, %arg1, %c0_i32 : i32, i32, i32
  }
}

</mosaic_0001>

<bundles_post_ra>
// kernel: tpu_custom_call.1
= control target key start
LH: loop header
LB: loop body
LE: loop exit
PB: predicated region body
PF: predicated region fallthrough
CT: control target
= control target key end

     0   :  { %s3942_s0 = inlined_call_operand.hbm [shape: f32[2,16,128], index: 0, kind: input, shape index: {}]   ;;  %s3943_s1 = inlined_call_operand.vmem [shape: f32[1,128], index: 1, kind: input, shape index: {}]   ;;  %s3944_s2 = inlined_call_operand.vmem [shape: f32[1,128], index: 2, kind: input, shape index: {}]   ;;  %s3945_s3 = inlined_call_operand.hbm [shape: bf16[128,512], index: 3, kind: input, shape index: {}]   ;;  %s3946_s4 = inlined_call_operand.hbm [shape: bf16[128,512], index: 4, kind: input, shape index: {}]   ;;  %s3947_s5 = inlined_call_operand.hbm [shape: bf16[128,512], index: 5, kind: input, shape index: {}]   ;;  %s3948_s6 = inlined_call_operand.hbm [shape: bf16[4,128,128], index: 6, kind: input, shape index: {}]   ;;  %s3949_s7 = inlined_call_operand.hbm [shape: f32[2,16,128], index: 7, kind: output, shape index: {}]  }
   0x1   :  { %3957 = sst [smem:[#allocation25_spill]] %s3945_s3 }
   0x2   :  { %3958 = sst [smem:[#allocation26_spill]] %s3946_s4 }
   0x3   :  { %3959 = sst [smem:[#allocation27_spill]] %s3947_s5 }
   0x4   :  { %3960 = sst [smem:[#allocation28_spill]] %s3948_s6 }
   0x5   :  { %3961 = sst [smem:[#allocation29_spill]] %s3949_s7 }
   0x6   :  { %12 = vsyncpa [#allocation6], 0 }
   0x7   :  { %14 = vsyncpa [#allocation6 + $0x1], 0 }
   0x8   :  { %15 = vsyncpa [#allocation9], 0 }
   0x9   :  { %16 = vsyncpa [#allocation12], 0 }
   0xa   :  { %17 = vsyncpa [#allocation7], 0 }
   0xb   :  { %19 = vsyncpa [#allocation7 + $0x1], 0  ;;  %s3553_s24 = smov 0   ;;  %s3555_s25 = smov 0  }
   0xc   :  { %s3557_s26 = smov 0   ;;  %s3559_s27 = smov 0  }
   0xd   :  { %s3561_s28 = smov 0   ;;  %s3563_s29 = smov 0  }
   0xe   :  { %s3565_s30 = smov 0   ;;  %s3567_s8 = smov 0  }
   0xf   :  { %s3569_s9 = smov 0   ;;  %s3571_s10 = smov 0  }
  0x10   :  { %s3573_s11 = smov 0  }
  0x11 LB: > { %3962 = sst [smem:[#allocation19_spill]] %s3456_s24  ;;  %s2419_s12 = sadd.s32 4294967295, %s3496_s11   ;;  %s3496_s11 = sphi %s3573_s11, %s25_s11   ;;  %s3492_s10 = sphi %s3571_s10, %s3996_s10   ;;  %s3488_s9 = sphi %s3569_s9, %s3988_s9   ;;  %s3484_s8 = sphi %s3567_s8, %s3995_s8   ;;  %s3480_s30 = sphi %s3565_s30, %s3987_s30   ;;  %s3476_s29 = sphi %s3563_s29, %s3994_s29   ;;  %s3472_s28 = sphi %s3561_s28, %s3993_s28   ;;  %s3468_s27 = sphi %s3559_s27, %s3992_s27   ;;  %s3464_s26 = sphi %s3557_s26, %s3991_s26   ;;  %s3460_s25 = sphi %s3555_s25, %s3990_s25   ;;  %s3456_s24 = sphi %s3553_s24, %s3989_s24  }
  0x12   : > { %3963 = sst [smem:[#allocation20_spill]] %s3484_s8  ;;  %s2420_s13 = sadd.s32 4294967294, %s3496_s11  }
  0x13   : > { %3964 = sst [smem:[#allocation21_spill]] %s3488_s9  ;;  %p57_p0 = scmp.ne.s32.totalorder %s3472_s28, %s3468_s27 }
  0x14   : > { %p3609_p1 = scmp.eq.s32.totalorder %s2419_s12, 0  ;;  %p208_p2 = scmp.ne.s32.totalorder %s3464_s26, %s3460_s25 }
  0x15   : > { %p209_p3 = scmp.eq.s32.totalorder %s2419_s12, 3  ;;  %p214_p5 = scmp.ne.s32.totalorder %s3460_s25, %s3456_s24 }
  0x16   : > { %p3617_p4 = por %p3609_p1, %p57_p0  ;;  %p215_p7 = scmp.eq.s32.totalorder %s2420_s13, 3 }
  0x17   : > { %p3623_p6 = por %p209_p3, %p208_p2  ;;  %p2421_p8 = scmp.ge.s32.totalorder %s3496_s11, 1 }
  0x18   : > { %p222_p9 = scmp.lt.s32.totalorder %s3496_s11, 5  ;;  %p3629_p10 = por %p215_p7, %p214_p5 }
  0x19   : > { %s3967_s16 = scalar_select %p3623_p6, 1, 0 }
  0x1a   : > { %s3969_s17 = scalar_select %p3629_p10, 1, 0 }
  0x1b   : > { %3968 = sst [smem:[#allocation22_spill]] %s3967_s16  ;;  %p3633_p11 = pnand %p2421_p8, %p222_p9 }
  0x1c   : > { %3970 = sst [smem:[#allocation23_spill]] %s3969_s17  ;;  %s3498_s19 = smov [#allocation8]  }
  0x1d   : > { %s240_s20 = sshll.u32 %s3498_s19, 4  ;;  %p2896_p12 = pneg %p3633_p11  ;;  %s241_s20 = int_to_ptr.vmem [resolvable:$true] %s240_s20 }
  0x1e   : > { %s3499_s22 = smov [#allocation11]   ;;  %s3247_s27 = scalar_lea.vmem %s241_s20, 4096 }
  0x1f   : > { %p3641_p13 = pnand %p2896_p12, %p3609_p1  ;;  %s266_s23 = sshll.u32 %s3499_s22, 4  ;;  %s267_s23 = int_to_ptr.vmem [resolvable:$true] %s266_s23 }
  0x20   : > { %p3248_p2 = scmp.ne.s32.totalorder %s241_s20, %s3247_s27  ;;  %p3255_p7 = scmp.lt.s32.totalorder %s241_s20, %s241_s20 }
  0x21   : > { %p3238_p0 = pneg %p3641_p13  ;;  %p3256_p8 = scmp.lt.s32.totalorder %s3247_s27, %s3247_s27 }
  0x23   : > { %p3250_p3 = pnand %p3248_p2, %p3238_p0  ;;  %p3257_p9 = por %p3256_p8, %p3255_p7 }
  0x25   : > { %p3251_p5 = pneg %p3250_p3 }
  0x27   : > { %p3258_p12 = pnand %p3257_p9, %p3251_p5 }
  0x29   : > { %3261 = shalt.err (!%p3258_p12)
}
  0x2a   : > { %s3500_s12 = smov 256   ;;  %s3501_s13 = smov 16  }
  0x2b   : > { %s3973_s3 = sld [smem:[#allocation25_spill]]  ;;  %s3273_s17 = scalar_lea.vmem %s267_s23, 4096 }
  0x2c   : > { %p3274_p2 = scmp.ne.s32.totalorder %s267_s23, %s3273_s17  ;;  %p3281_p5 = scmp.lt.s32.totalorder %s267_s23, %s267_s23 }
  0x2d   : > { %p3282_p8 = scmp.lt.s32.totalorder %s3273_s17, %s3273_s17 }
  0x2e   : > { %p3276_p3 = pnand %p3274_p2, %p3238_p0 }
  0x2f   : > { %p3283_p9 = por %p3282_p8, %p3281_p5 }
  0x30   : > { %p3277_p7 = pneg %p3276_p3 }
  0x31   : > { %2899 = dma.hbm_to_vmem [thread:$0]  (!%p3641_p13), %s3973_s3, 4096, %s241_s20, [#allocation9], %s3500_s12, %s3500_s12, %s3501_s13  }
  0x32   : > { %p3284_p12 = pnand %p3283_p9, %p3277_p7 }
  0x34   : > { %3287 = shalt.err (!%p3284_p12)
}
  0x35   : > { %s3974_s5 = sld [smem:[#allocation27_spill]]  ;;  %s3502_s20 = smov [#allocation10]  }
  0x36   : > { %s253_s19 = sshll.u32 %s3502_s20, 4  ;;  %s3503_s22 = smov [#allocation13]   ;;  %s254_s19 = int_to_ptr.vmem [resolvable:$true] %s253_s19 }
  0x37   : > { %s279_s3 = sshll.u32 %s3503_s22, 4  ;;  %s3299_s7 = scalar_lea.vmem %s254_s19, 4096  ;;  %s280_s3 = int_to_ptr.vmem [resolvable:$true] %s279_s3 }
  0x38   : > { %p3300_p2 = scmp.ne.s32.totalorder %s254_s19, %s3299_s7  ;;  %p3307_p5 = scmp.lt.s32.totalorder %s254_s19, %s254_s19 }
  0x39   : > { %p3308_p8 = scmp.lt.s32.totalorder %s3299_s7, %s3299_s7 }
  0x3a   : > { %p3302_p3 = pnand %p3300_p2, %p3238_p0 }
  0x3b   : > { %2905 = dma.hbm_to_vmem [thread:$0]  (!%p3641_p13), %s3974_s5, 4096, %s267_s23, [#allocation12], %s3500_s12, %s3500_s12, %s3501_s13  }
  0x3c   : > { %p3303_p7 = pneg %p3302_p3  ;;  %p3309_p9 = por %p3308_p8, %p3307_p5 }
  0x3e   : > { %p3310_p12 = pnand %p3309_p9, %p3303_p7 }
  0x40   : > { %3313 = shalt.err (!%p3310_p12)
}
  0x41   : > { %s3975_s4 = sld [smem:[#allocation26_spill]]  ;;  %s3325_s23 = scalar_lea.vmem %s280_s3, 4096 }
  0x42   : > { %p3326_p10 = scmp.ne.s32.totalorder %s280_s3, %s3325_s23  ;;  %p3333_p5 = scmp.lt.s32.totalorder %s280_s3, %s280_s3 }
  0x43   : > { %p3334_p7 = scmp.lt.s32.totalorder %s3325_s23, %s3325_s23 }
  0x44   : > { %p3328_p2 = pnand %p3326_p10, %p3238_p0 }
  0x45   : > { %p3335_p8 = por %p3334_p7, %p3333_p5 }
  0x46   : > { %p3329_p3 = pneg %p3328_p2 }
  0x47   : > { %2902 = dma.hbm_to_vmem [thread:$0]  (!%p3641_p13), %s3975_s4, 4096, %s254_s19, [#allocation9], %s3500_s12, %s3500_s12, %s3501_s13  }
  0x48   : > { %p3336_p9 = pnand %p3335_p8, %p3329_p3 }
  0x4a   : > { %3339 = shalt.err (!%p3336_p9)
}
  0x4b   : > { %s3504_s7 = smov 64   ;;  %s3505_s12 = smov 4  }
  0x4c   : > { %s3976_s6 = sld [smem:[#allocation28_spill]]  ;;  %s34_s20 = sadd.s32 1, %s3488_s9 }
  0x4d   : > { %p35_p10 = scmp.ge.s32.totalorder %s34_s20, 2  ;;  %s37_s19 = sadd.s32 1, %s3492_s10 }
  0x4e   : > { %s44_s22 = sadd.s32 1, %s3476_s29  ;;  %p51_p0 = scmp.ne.s32.totalorder %s3476_s29, %s3472_s28 }
  0x4f   : > { %s3998_s20 = smov (%p35_p10, %s34_s20), 0  ;;  %s4000_s19 = smov (!%p35_p10, %s37_s19), %s3492_s10 }
  0x50   : > { %3977 = sst [smem:[#allocation24_spill]] %s3998_s20  ;;  %p52_p12 = scmp.eq.s32.totalorder %s3496_s11, 0 }
  0x51   : > { %s194_s21 = ssub.s32 %s3488_s9, %s3998_s20  ;;  %p39_p2 = scmp.ge.s32.totalorder %s4000_s19, 2 }
  0x52   : > { %2908 = dma.hbm_to_vmem [thread:$0]  (!%p3641_p13), %s3976_s6, 4096, %s280_s3, [#allocation12], %s3504_s7, %s3504_s7, %s3505_s12  }
  0x53   : > { %s198_s24 = sadd.s32 1, %s3464_s26  ;;  %p3700_p3 = por %p52_p12, %p51_p0 }
  0x54   : > { %p2921_p13 = scmp.lt.s32.totalorder %s3496_s11, 4  ;;  %s4002_s19 = smov (%p39_p2, %s4000_s19), 0 }
  0x55   : > { %s293_s17 = sand.u32 1, %s3476_s29   ;;  %s2611_s23 = sshll.u32 %s3492_s10, 8 }
  0x56   : > { %s41_s7 = ssub.s32 %s3492_s10, %s4002_s19  ;;  %s2427_s13 = sshll.u32 %s293_s17, 4 }
  0x57   : > { %p42_p5 = scmp.eq.s32.totalorder %s41_s7, 0  ;;  %s195_s12 = sor.u32 %s194_s21, %s41_s7 }
  0x58   : > { %p196_p7 = scmp.eq.s32.totalorder %s195_s12, 0  ;;  %s303_s20 = scalar_lea.hbm %s3942_s0, %s2611_s23 }
  0x59   : > { %s3712_s27 = scalar_select %p42_p5, %s3476_s29, %s44_s22  }
  0x5a   : > { %s3715_s4 = scalar_select %p196_p7, %s3464_s26, %s198_s24  }
  0x5b   : > { %s297_s9 = scalar_lea.vmem [#allocation5], %s2427_s13  ;;  %p3724_p8 = pnand %p2921_p13, %p3700_p3 }
  0x5c   : > { %s304_s16 = sshll.u32 %s297_s9, 4  ;;  %s294_s21 = scalar_lea.sflag [#allocation6], %s293_s17  ;;  %s305_s16 = int_to_ptr.vmem [resolvable:$true] %s304_s16 }
  0x5d   : > { %p3342_p9 = pneg %p3724_p8  ;;  %s3353_s22 = scalar_lea.vmem %s305_s16, 256 }
  0x5e   : > { %p3354_p10 = scmp.ne.s32.totalorder %s305_s16, %s3353_s22  ;;  %s3506_s24 = smov [#allocation5]  }
  0x5f   : > { %s3358_s5 = sshll.u32 %s3506_s24, 4  ;;  %s3359_s5 = int_to_ptr.vmem [resolvable:$false] %s3358_s5 }
  0x60   : > { %p3356_p0 = pnand %p3354_p10, %p3342_p9  ;;  %s3360_s6 = scalar_lea.vmem %s3359_s5, 512 }
  0x61   : > { %p3361_p2 = scmp.lt.s32.totalorder %s305_s16, %s3359_s5  ;;  %p3362_p5 = scmp.lt.s32.totalorder %s3360_s6, %s3353_s22 }
  0x62   : > { %p3357_p12 = pneg %p3356_p0 }
  0x63   : > { %p3363_p7 = por %p3362_p5, %p3361_p2 }
  0x65   : > { %p3364_p3 = pnand %p3363_p7, %p3357_p12 }
  0x67   : > { %3367 = shalt.err (!%p3364_p3)
}
  0x68   : > { %s3507_s9 = smov 128   ;;  %s3508_s3 = smov 8  }
  0x69   : > { %2912 = dma.hbm_to_vmem [thread:$0]  (!%p3724_p8), %s303_s20, 256, %s305_s16, %s294_s21, %s3507_s9, %s3507_s9, %s3508_s3  }
  0x6a   : > { %316 = sbr.rel (%p3633_p11) target bundleno = 1677 (0x68d), region = 48  ;;  %s318_s17 = sand.u32 (!%p3633_p11), 1, %s3472_s28  }
  0x6b   : > { %s2431_s23 = sshll.u32 (!%p3633_p11), %s318_s17, 4  ;;  %s319_s7 = scalar_lea.sflag (!%p3633_p11), [#allocation6], %s318_s17 }
  0x6c   : > { %s3735_s12 = scalar_lea.vmem (!%p3633_p11), [#allocation5], %s2431_s23 }
  0x6f   : > { %3439 = dma.done.wait (%p3617_p4), %s319_s7, 256  }
  0x70   : > { %3441 = vsyncadd (%p3617_p4), %s319_s7, 4294967040 }
  0x71   : > { %3443 = dma.done.wait (%p3609_p1), [#allocation9], 8192  }
  0x72   : > { %3445 = vsyncadd (%p3609_p1), [#allocation9], 4294959104 }
  0x73   : > { %3447 = dma.done.wait (%p3609_p1), [#allocation12], 8192  }
  0x74   : > { %3449 = vsyncadd (%p3609_p1), [#allocation12], 4294959104  ;;  %s366_s8 = sand.u32 1, %s3460_s25   ;;  %p2437_p4 = scmp.ne.s32.totalorder %s3480_s30, 0 }
  0x75   : > { %s3752_s16 = sshll.u32 %s366_s8, 3 }
  0x76   : > { %s368_s15 = scalar_lea.vmem [#allocation14], %s3752_s16  ;;  %373 = sbr.rel (%p2437_p4) target bundleno = 718 (0x2ce), region = 72 }
  0x7b   : > { %v374_v0 = vld [vmem:[%s3735_s12] sm:$0xff]  ;;  %v375_v1 = vld [vmem:[%s3735_s12 + $0x8] sm:$0xff]  ;;  %v3509_v36 = vmov 0  }
  0x7c   : > { %378 = vadd.xlane.f32.xlu0 %v374_v0  ;;  %v3028_v10 = vld [vmem:[#allocation8 + $0xe4] ss:$16 sps:$4 sm:$0xff]   ;;  %v3030_v11 = vld [vmem:[#allocation8 + $0xec] ss:$16 sps:$4 sm:$0xff]   ;;  %v3032_v12 = vld [vmem:[#allocation8 + $0xe0] ss:$16 sps:$4 sm:$0xff]   ;;  %656 = vmatprep.mubr.bf16.mxu0 %v3509_v36 }
  0x7d   : > { %v3033_v13 = vld [vmem:[#allocation8 + $0xe8] ss:$16 sps:$4 sm:$0xff]   ;;  %624 = vmatprep.subr.bf16.mxu0 %v3028_v10  ;;  %667 = vmatprep.subr.bf16.mxu1 %v3030_v11  ;;  %v3034_v14 = vld [vmem:[#allocation8 + $0xc4] ss:$16 sps:$4 sm:$0xff]   ;;  %v3036_v15 = vld [vmem:[#allocation8 + $0xcc] ss:$16 sps:$4 sm:$0xff]  }
  0x7e   : > { %625 = vmatpush1.bf16.msra.mxu0 %v3032_v12  ;;  %668 = vmatpush1.bf16.msra.mxu1 %v3033_v13  ;;  %v3038_v16 = vld [vmem:[#allocation8 + $0xc0] ss:$16 sps:$4 sm:$0xff]   ;;  %v3039_v17 = vld [vmem:[#allocation8 + $0xc8] ss:$16 sps:$4 sm:$0xff]   ;;  %v3040_v18 = vld [vmem:[#allocation8 + $0xa4] ss:$16 sps:$4 sm:$0xff]  }
  0x7f   : > { %626 = vmatprep.subr.bf16.mxu0 %v3034_v14  ;;  %669 = vmatprep.subr.bf16.mxu1 %v3036_v15  ;;  %v3042_v19 = vld [vmem:[#allocation8 + $0xac] ss:$16 sps:$4 sm:$0xff]   ;;  %v3044_v20 = vld [vmem:[#allocation8 + $0xa0] ss:$16 sps:$4 sm:$0xff]   ;;  %v3045_v21 = vld [vmem:[#allocation8 + $0xa8] ss:$16 sps:$4 sm:$0xff]  }
  0x80   : > { %380 = vadd.xlane.f32.xlu0 %v375_v1  ;;  %v3046_v22 = vld [vmem:[#allocation8 + $0x84] ss:$16 sps:$4 sm:$0xff]   ;;  %v3048_v23 = vld [vmem:[#allocation8 + $0x8c] ss:$16 sps:$4 sm:$0xff]   ;;  %v3050_v24 = vld [vmem:[#allocation8 + $0x80] ss:$16 sps:$4 sm:$0xff]   ;;  %699 = vmatprep.mubr.bf16.mxu1 %v3509_v36 }
  0x81   : > { %v3051_v25 = vld [vmem:[#allocation8 + $0x88] ss:$16 sps:$4 sm:$0xff]   ;;  %v3052_v26 = vld [vmem:[#allocation8 + $0x64] ss:$16 sps:$4 sm:$0xff]   ;;  %v3054_v27 = vld [vmem:[#allocation8 + $0x6c] ss:$16 sps:$4 sm:$0xff]  }
  0x82   : > { %627 = vmatpush1.bf16.msra.mxu0 %v3038_v16  ;;  %670 = vmatpush1.bf16.msra.mxu1 %v3039_v17  ;;  %v3056_v28 = vld [vmem:[#allocation8 + $0x60] ss:$16 sps:$4 sm:$0xff]   ;;  %v3057_v29 = vld [vmem:[#allocation8 + $0x68] ss:$16 sps:$4 sm:$0xff]   ;;  %v3058_v30 = vld [vmem:[#allocation8 + $0x44] ss:$16 sps:$4 sm:$0xff]  }
  0x83   : > { %628 = vmatprep.subr.bf16.mxu0 %v3040_v18  ;;  %671 = vmatprep.subr.bf16.mxu1 %v3042_v19  ;;  %v3060_v31 = vld [vmem:[#allocation8 + $0x4c] ss:$16 sps:$4 sm:$0xff]   ;;  %v3062_v32 = vld [vmem:[#allocation8 + $0x40] ss:$16 sps:$4 sm:$0xff]   ;;  %v3063_v33 = vld [vmem:[#allocation8 + $0x48] ss:$16 sps:$4 sm:$0xff]  }
  0x84   : > { %v3064_v34 = vld [vmem:[#allocation8 + $0x24] ss:$16 sps:$4 sm:$0xff]   ;;  %v3066_v35 = vld [vmem:[#allocation8 + $0x2c] ss:$16 sps:$4 sm:$0xff]   ;;  %v3068_v37 = vld [vmem:[#allocation8 + $0x20] ss:$16 sps:$4 sm:$0xff]  }
  0x85   : > { %v3069_v38 = vld [vmem:[#allocation8 + $0x28] ss:$16 sps:$4 sm:$0xff]   ;;  %v3070_v39 = vld [vmem:[#allocation8 + $0x4] ss:$16 sps:$4 sm:$0xff]   ;;  %v3072_v40 = vld [vmem:[#allocation8 + $0xc] ss:$16 sps:$4 sm:$0xff]  }
  0x86   : > { %629 = vmatpush1.bf16.msra.mxu0 %v3044_v20  ;;  %672 = vmatpush1.bf16.msra.mxu1 %v3045_v21  ;;  %v3074_v41 = vld [vmem:[#allocation8] ss:$16 sps:$4 sm:$0xff]   ;;  %v3075_v42 = vld [vmem:[#allocation8 + $0x8] ss:$16 sps:$4 sm:$0xff]   ;;  %v3078_v43 = vld [vmem:[#allocation10 + $0xe4] ss:$16 sps:$4 sm:$0xff]  }
  0x87   : > { %630 = vmatprep.subr.bf16.mxu0 %v3046_v22  ;;  %673 = vmatprep.subr.bf16.mxu1 %v3048_v23  ;;  %v3081_v44 = vld [vmem:[#allocation10 + $0xec] ss:$16 sps:$4 sm:$0xff]   ;;  %v2438_v61 = vld [vmem:[%s3943_s1] ss:$0 sm:$0xff]  ;;  %v3079_v10 = vld [vmem:[#allocation10 + $0xe8] ss:$16 sps:$4 sm:$0xff]  }
  0x88   : > { %v3084_v12 = vld [vmem:[#allocation10 + $0xc4] ss:$16 sps:$4 sm:$0xff]   ;;  %v3087_v13 = vld [vmem:[#allocation10 + $0xcc] ss:$16 sps:$4 sm:$0xff]   ;;  %v3088_v16 = vld [vmem:[#allocation10 + $0xa0] ss:$16 sps:$4 sm:$0xff]  }
  0x89   : > { %v3090_v14 = vld [vmem:[#allocation10 + $0xa4] ss:$16 sps:$4 sm:$0xff]   ;;  %v3093_v15 = vld [vmem:[#allocation10 + $0xac] ss:$16 sps:$4 sm:$0xff]   ;;  %v3091_v17 = vld [vmem:[#allocation10 + $0xa8] ss:$16 sps:$4 sm:$0xff]  }
  0x8a   : > { %631 = vmatpush1.bf16.msra.mxu0 %v3050_v24  ;;  %674 = vmatpush1.bf16.msra.mxu1 %v3051_v25  ;;  %v3096_v18 = vld [vmem:[#allocation10 + $0x84] ss:$16 sps:$4 sm:$0xff]   ;;  %v3099_v19 = vld [vmem:[#allocation10 + $0x8c] ss:$16 sps:$4 sm:$0xff]   ;;  %v3094_v20 = vld [vmem:[#allocation10 + $0x80] ss:$16 sps:$4 sm:$0xff]  }
  0x8b   : > { %632 = vmatprep.subr.bf16.mxu0 %v3052_v26  ;;  %675 = vmatprep.subr.bf16.mxu1 %v3054_v27  ;;  %v3097_v21 = vld [vmem:[#allocation10 + $0x88] ss:$16 sps:$4 sm:$0xff]   ;;  %v3102_v22 = vld [vmem:[#allocation10 + $0x64] ss:$16 sps:$4 sm:$0xff]   ;;  %v3105_v23 = vld [vmem:[#allocation10 + $0x6c] ss:$16 sps:$4 sm:$0xff]  }
  0x8c   : > { %v3100_v24 = vld [vmem:[#allocation10 + $0x60] ss:$16 sps:$4 sm:$0xff]   ;;  %v3103_v25 = vld [vmem:[#allocation10 + $0x68] ss:$16 sps:$4 sm:$0xff]   ;;  %v3108_v26 = vld [vmem:[#allocation10 + $0x44] ss:$16 sps:$4 sm:$0xff]  }
  0x8d   : > { %v3111_v27 = vld [vmem:[#allocation10 + $0x4c] ss:$16 sps:$4 sm:$0xff]  }
  0x8e   : > { %633 = vmatpush1.bf16.msra.mxu0 %v3056_v28  ;;  %676 = vmatpush1.bf16.msra.mxu1 %v3057_v29  ;;  %v3106_v28 = vld [vmem:[#allocation10 + $0x40] ss:$16 sps:$4 sm:$0xff]   ;;  %v3109_v29 = vld [vmem:[#allocation10 + $0x48] ss:$16 sps:$4 sm:$0xff]  }
  0x8f   : > { %634 = vmatprep.subr.bf16.mxu0 %v3058_v30  ;;  %677 = vmatprep.subr.bf16.mxu1 %v3060_v31  ;;  %v3114_v30 = vld [vmem:[#allocation10 + $0x24] ss:$16 sps:$4 sm:$0xff]   ;;  %v3117_v31 = vld [vmem:[#allocation10 + $0x2c] ss:$16 sps:$4 sm:$0xff]  }
  0x92   : > { %635 = vmatpush1.bf16.msra.mxu0 %v3062_v32  ;;  %678 = vmatpush1.bf16.msra.mxu1 %v3063_v33  ;;  %v3112_v32 = vld [vmem:[#allocation10 + $0x20] ss:$16 sps:$4 sm:$0xff]   ;;  %v3115_v33 = vld [vmem:[#allocation10 + $0x28] ss:$16 sps:$4 sm:$0xff]  }
  0x93   : > { %636 = vmatprep.subr.bf16.mxu0 %v3064_v34  ;;  %679 = vmatprep.subr.bf16.mxu1 %v3066_v35  ;;  %v3120_v34 = vld [vmem:[#allocation10 + $0x4] ss:$16 sps:$4 sm:$0xff]   ;;  %v3123_v35 = vld [vmem:[#allocation10 + $0xc] ss:$16 sps:$4 sm:$0xff]  }
  0x96   : > { %637 = vmatpush1.bf16.msra.mxu0 %v3068_v37  ;;  %680 = vmatpush1.bf16.msra.mxu1 %v3069_v38  ;;  %v3118_v37 = vld [vmem:[#allocation10] ss:$16 sps:$4 sm:$0xff]   ;;  %v3121_v38 = vld [vmem:[#allocation10 + $0x8] ss:$16 sps:$4 sm:$0xff]  }
  0x97   : > { %638 = vmatprep.subr.bf16.mxu0 %v3070_v39  ;;  %681 = vmatprep.subr.bf16.mxu1 %v3072_v40  ;;  %v3126_v39 = vld [vmem:[#allocation11 + $0xe4] ss:$16 sps:$4 sm:$0xff]   ;;  %v3129_v40 = vld [vmem:[#allocation11 + $0xec] ss:$16 sps:$4 sm:$0xff]  }
  0x9a   : > { %639 = vmatpush1.bf16.msra.mxu0 %v3074_v41  ;;  %682 = vmatpush1.bf16.msra.mxu1 %v3075_v42  ;;  %v3124_v41 = vld [vmem:[#allocation11 + $0xe0] ss:$16 sps:$4 sm:$0xff]   ;;  %v3127_v42 = vld [vmem:[#allocation11 + $0xe8] ss:$16 sps:$4 sm:$0xff]  }
  0x9b   : > { %902 = vmatprep.subr.bf16.mxu0 %v3078_v43  ;;  %945 = vmatprep.subr.bf16.mxu1 %v3081_v44  ;;  %v3132_v43 = vld [vmem:[#allocation11 + $0xc4] ss:$16 sps:$4 sm:$0xff]   ;;  %v3135_v44 = vld [vmem:[#allocation11 + $0xcc] ss:$16 sps:$4 sm:$0xff]  }
 0x105   : > { %v379_v2 = vpop.xlane.xlu0 %378 }
 0x106   : > { %v383_v3 = vmul.f32 0.0078125, %v379_v2 }
 0x108   : > { %v3758_v4 = vsub.f32 %v374_v0, %v383_v3  ;;  %v2439_v3 = vld [vmem:[%s3944_s2] ss:$0 sm:$0xff] }
 0x109   : > { %v381_v5 = vpop.xlane.xlu0 %380 }
 0x10a   : > { %v384_v6 = vmul.f32 0.0078125, %v381_v5  ;;  %v387_v7 = vmul.f32 %v3758_v4, %v3758_v4  ;;  %v419_v63 = vmul.f32 %v2438_v61, %v3758_v4  ;;  %v3082_v4 = vld [vmem:[#allocation10 + $0xc0] ss:$16 sps:$4 sm:$0xff]  }
 0x10c   : > { %v3762_v8 = vsub.f32 %v375_v1, %v384_v6  ;;  %389 = vadd.xlane.f32.xlu1 %v387_v7 }
 0x10e   : > { %v388_v9 = vmul.f32 %v3762_v8, %v3762_v8  ;;  %v420_v0 = vmul.f32 %v2438_v61, %v3762_v8  ;;  %v3085_v8 = vld [vmem:[#allocation10 + $0xc8] ss:$16 sps:$4 sm:$0xff]  }
 0x10f   : > { %v3157_v61 = vld [vmem:[#allocation11 + $0x48] ss:$16 sps:$4 sm:$0xff]  }
 0x110   : > { %391 = vadd.xlane.f32.xlu1 %v388_v9  ;;  %v3076_v9 = vld [vmem:[#allocation10 + $0xe0] ss:$16 sps:$4 sm:$0xff]  }
 0x195   : > { %v390_v45 = vpop.xlane.xlu1 %389 }
 0x196   : > { %v393_v46 = vmul.f32 0.007874016, %v390_v45  ;;  %v3130_v45 = vld [vmem:[#allocation11 + $0xc0] ss:$16 sps:$4 sm:$0xff]  }
 0x198   : > { %3172 = vrsqrt.f32 %v393_v46  ;;  %vm397_vm0 = vcmp.eq.f32.partialorder %v393_v46, inf  ;;  %v400_v51 = vand.u32 2147483648, %v393_v46  ;;  %vm399_vm1 = vcmp.eq.f32.partialorder %v393_v46, 0.0 }
 0x199   : > { %v392_v47 = vpop.xlane.xlu1 %391 }
 0x19a   : > { %v394_v48 = vmul.f32 0.007874016, %v392_v47  ;;  %v3138_v47 = vld [vmem:[#allocation11 + $0xa4] ss:$16 sps:$4 sm:$0xff]  }
 0x19c   : > { %3174 = vrsqrt.f32 %v394_v48  ;;  %vm404_vm2 = vcmp.eq.f32.partialorder %v394_v48, inf  ;;  %v407_v57 = vand.u32 2147483648, %v394_v48  ;;  %vm406_vm3 = vcmp.eq.f32.partialorder %v394_v48, 0.0 }
 0x1a5   : > { %v3173_v49 = vpop.eup %3172 }
 0x1a6   : > { %v396_v50 = vmul.f32 %v3173_v49, %v393_v46  ;;  %v3136_v49 = vld [vmem:[#allocation11 + $0xa0] ss:$16 sps:$4 sm:$0xff]  }
 0x1a8   : > { %v398_v52 = vsel %vm397_vm0, %v393_v46, %v396_v50  ;;  %v3133_v46 = vld [vmem:[#allocation11 + $0xc8] ss:$16 sps:$4 sm:$0xff]  }
 0x1a9   : > { %v3175_v53 = vpop.eup %3174  ;;  %v401_v54 = vsel %vm399_vm1, %v400_v51, %v398_v52  ;;  %v3139_v50 = vld [vmem:[#allocation11 + $0xa8] ss:$16 sps:$4 sm:$0xff]   ;;  %v3144_v51 = vld [vmem:[#allocation11 + $0x84] ss:$16 sps:$4 sm:$0xff]   ;;  %v3147_v52 = vld [vmem:[#allocation11 + $0x8c] ss:$16 sps:$4 sm:$0xff]  }
 0x1aa   : > { %v409_v55 = vadd.f32 1e-06, %v401_v54  ;;  %v403_v56 = vmul.f32 %v3175_v53, %v394_v48  ;;  %v3142_v53 = vld [vmem:[#allocation11 + $0x80] ss:$16 sps:$4 sm:$0xff]   ;;  %v3145_v54 = vld [vmem:[#allocation11 + $0x88] ss:$16 sps:$4 sm:$0xff]  }
 0x1ac   : > { %3176 = vrcp.f32 %v409_v55  ;;  %v405_v58 = vsel %vm404_vm2, %v394_v48, %v403_v56  ;;  %v3141_v48 = vld [vmem:[#allocation11 + $0xac] ss:$16 sps:$4 sm:$0xff]   ;;  %v3150_v55 = vld [vmem:[#allocation11 + $0x64] ss:$16 sps:$4 sm:$0xff]  }
 0x1ad   : > { %v408_v59 = vsel %vm406_vm3, %v407_v57, %v405_v58  ;;  %v3153_v56 = vld [vmem:[#allocation11 + $0x6c] ss:$16 sps:$4 sm:$0xff]   ;;  %v3148_v57 = vld [vmem:[#allocation11 + $0x60] ss:$16 sps:$4 sm:$0xff]   ;;  %v3156_v58 = vld [vmem:[#allocation11 + $0x44] ss:$16 sps:$4 sm:$0xff]  }
 0x1ae   : > { %v410_v60 = vadd.f32 1e-06, %v408_v59  ;;  %v3159_v59 = vld [vmem:[#allocation11 + $0x4c] ss:$16 sps:$4 sm:$0xff]  }
 0x1b0   : > { %3178 = vrcp.f32 %v410_v60  ;;  %v3154_v60 = vld [vmem:[#allocation11 + $0x40] ss:$16 sps:$4 sm:$0xff]  }
 0x1b9   : > { %v3177_v62 = vpop.eup %3176 }
 0x1ba   : > { %v421_v1 = vmul.f32 %v3177_v62, %v419_v63  ;;  %v3162_v62 = vld [vmem:[#allocation11 + $0x24] ss:$16 sps:$4 sm:$0xff]   ;;  %v3165_v63 = vld [vmem:[#allocation11 + $0x2c] ss:$16 sps:$4 sm:$0xff]  }
 0x1bc   : > { %v429_v6 = vadd.f32 %v2439_v3, %v421_v1  ;;  %v3163_v1 = vld [vmem:[#allocation11 + $0x28] ss:$16 sps:$4 sm:$0xff]  }
 0x1bd   : > { %v3179_v2 = vpop.eup %3178 }
 0x1be   : > { %v422_v5 = vmul.f32 %v3179_v2, %v420_v0  ;;  %v3160_v0 = vld [vmem:[#allocation11 + $0x20] ss:$16 sps:$4 sm:$0xff]   ;;  %v3168_v2 = vld [vmem:[#allocation11 + $0x4] ss:$16 sps:$4 sm:$0xff]  }
 0x1c0   : > { %v430_v7 = vadd.f32 %v2439_v3, %v422_v5  ;;  %v3171_v3 = vld [vmem:[#allocation11 + $0xc] ss:$16 sps:$4 sm:$0xff]   ;;  %v3166_v5 = vld [vmem:[#allocation11] ss:$16 sps:$4 sm:$0xff]  }
 0x1c2   : > { %v3776_v11 = vpack.c.bf16 %v430_v7, %v429_v6  ;;  %v3169_v6 = vld [vmem:[#allocation11 + $0x8] ss:$16 sps:$4 sm:$0xff]  }
 0x1c4   : > { %657 = vmatmul.mubr.bf16.vlgmr.msra.gmra.mxu0 %v3776_v11  ;;  %700 = vmatmul.mubr.bf16.vlgmr.msra.gmra.mxu1 %v3776_v11 }
 0x1c5   : > { %903 = vmatpush1.bf16.msra.mxu0 %v3076_v9  ;;  %946 = vmatpush1.bf16.msra.mxu1 %v3079_v10 }
 0x1c6   : > { %904 = vmatprep.subr.bf16.mxu0 %v3084_v12  ;;  %947 = vmatprep.subr.bf16.mxu1 %v3087_v13 }
 0x1c7   : > { %934 = vmatprep.mubr.bf16.mxu0 %v3509_v36  ;;  %977 = vmatprep.mubr.bf16.mxu1 %v3509_v36 }
 0x1c9   : > { %905 = vmatpush1.bf16.msra.mxu0 %v3082_v4  ;;  %948 = vmatpush1.bf16.msra.mxu1 %v3085_v8 }
 0x1ca   : > { %906 = vmatprep.subr.bf16.mxu0 %v3090_v14  ;;  %949 = vmatprep.subr.bf16.mxu1 %v3093_v15 }
 0x1cd   : > { %907 = vmatpush1.bf16.msra.mxu0 %v3088_v16  ;;  %950 = vmatpush1.bf16.msra.mxu1 %v3091_v17 }
 0x1ce   : > { %908 = vmatprep.subr.bf16.mxu0 %v3096_v18  ;;  %951 = vmatprep.subr.bf16.mxu1 %v3099_v19 }
 0x1d1   : > { %909 = vmatpush1.bf16.msra.mxu0 %v3094_v20  ;;  %952 = vmatpush1.bf16.msra.mxu1 %v3097_v21 }
 0x1d2   : > { %910 = vmatprep.subr.bf16.mxu0 %v3102_v22  ;;  %953 = vmatprep.subr.bf16.mxu1 %v3105_v23 }
 0x1d5   : > { %911 = vmatpush1.bf16.msra.mxu0 %v3100_v24  ;;  %954 = vmatpush1.bf16.msra.mxu1 %v3103_v25 }
 0x1d6   : > { %912 = vmatprep.subr.bf16.mxu0 %v3108_v26  ;;  %955 = vmatprep.subr.bf16.mxu1 %v3111_v27 }
 0x1d9   : > { %913 = vmatpush1.bf16.msra.mxu0 %v3106_v28  ;;  %956 = vmatpush1.bf16.msra.mxu1 %v3109_v29 }
 0x1da   : > { %914 = vmatprep.subr.bf16.mxu0 %v3114_v30  ;;  %957 = vmatprep.subr.bf16.mxu1 %v3117_v31 }
 0x1dd   : > { %915 = vmatpush1.bf16.msra.mxu0 %v3112_v32  ;;  %958 = vmatpush1.bf16.msra.mxu1 %v3115_v33 }
 0x1de   : > { %916 = vmatprep.subr.bf16.mxu0 %v3120_v34  ;;  %959 = vmatprep.subr.bf16.mxu1 %v3123_v35 }
 0x1e1   : > { %917 = vmatpush1.bf16.msra.mxu0 %v3118_v37  ;;  %960 = vmatpush1.bf16.msra.mxu1 %v3121_v38 }
 0x1e2   : > { %1180 = vmatprep.subr.bf16.mxu0 %v3126_v39  ;;  %1223 = vmatprep.subr.bf16.mxu1 %v3129_v40 }
 0x1e4   : > { %935 = vmatmul.mubr.bf16.vlgmr.msra.gmra.mxu0 %v3776_v11  ;;  %978 = vmatmul.mubr.bf16.vlgmr.msra.gmra.mxu1 %v3776_v11 }
 0x1e5   : > { %1181 = vmatpush1.bf16.msra.mxu0 %v3124_v41  ;;  %1224 = vmatpush1.bf16.msra.mxu1 %v3127_v42 }
 0x1e6   : > { %1182 = vmatprep.subr.bf16.mxu0 %v3132_v43  ;;  %1225 = vmatprep.subr.bf16.mxu1 %v3135_v44 }
 0x1e7   : > { %1212 = vmatprep.mubr.bf16.mxu0 %v3509_v36  ;;  %1255 = vmatprep.mubr.bf16.mxu1 %v3509_v36  ;;  %v3151_v36 = vld [vmem:[#allocation11 + $0x68] ss:$16 sps:$4 sm:$0xff]  }
 0x1e9   : > { %1183 = vmatpush1.bf16.msra.mxu0 %v3130_v45  ;;  %1226 = vmatpush1.bf16.msra.mxu1 %v3133_v46 }
 0x1ea   : > { %1184 = vmatprep.subr.bf16.mxu0 %v3138_v47  ;;  %1227 = vmatprep.subr.bf16.mxu1 %v3141_v48 }
 0x1ed   : > { %1185 = vmatpush1.bf16.msra.mxu0 %v3136_v49  ;;  %1228 = vmatpush1.bf16.msra.mxu1 %v3139_v50 }
 0x1ee   : > { %1186 = vmatprep.subr.bf16.mxu0 %v3144_v51  ;;  %1229 = vmatprep.subr.bf16.mxu1 %v3147_v52 }
 0x1f1   : > { %1187 = vmatpush1.bf16.msra.mxu0 %v3142_v53  ;;  %1230 = vmatpush1.bf16.msra.mxu1 %v3145_v54 }
 0x1f2   : > { %1188 = vmatprep.subr.bf16.mxu0 %v3150_v55  ;;  %1231 = vmatprep.subr.bf16.mxu1 %v3153_v56 }
 0x1f5   : > { %1189 = vmatpush1.bf16.msra.mxu0 %v3148_v57  ;;  %1232 = vmatpush1.bf16.msra.mxu1 %v3151_v36 }
 0x1f6   : > { %1190 = vmatprep.subr.bf16.mxu0 %v3156_v58  ;;  %1233 = vmatprep.subr.bf16.mxu1 %v3159_v59 }
 0x1f9   : > { %1191 = vmatpush1.bf16.msra.mxu0 %v3154_v60  ;;  %1234 = vmatpush1.bf16.msra.mxu1 %v3157_v61 }
 0x1fa   : > { %1192 = vmatprep.subr.bf16.mxu0 %v3162_v62  ;;  %1235 = vmatprep.subr.bf16.mxu1 %v3165_v63 }
 0x1fd   : > { %1193 = vmatpush1.bf16.msra.mxu0 %v3160_v0  ;;  %1236 = vmatpush1.bf16.msra.mxu1 %v3163_v1 }
 0x1fe   : > { %1194 = vmatprep.subr.bf16.mxu0 %v3168_v2  ;;  %1237 = vmatprep.subr.bf16.mxu1 %v3171_v3 }
 0x201   : > { %1195 = vmatpush1.bf16.msra.mxu0 %v3166_v5  ;;  %1238 = vmatpush1.bf16.msra.mxu1 %v3169_v6 }
 0x204   : > { %1213 = vmatmul.mubr.bf16.vlgmr.msra.gmra.mxu0 %v3776_v11  ;;  %1256 = vmatmul.mubr.bf16.vlgmr.msra.gmra.mxu1 %v3776_v11 }
 0x284   : > { %v658_v7 = vpop.f32.mrf.mxu0  ;;  %v701_v9 = vpop.f32.mrf.mxu1 }
 0x286   : > { %v660_v10 = vpop.f32.mrf.mxu0  ;;  %v703_v12 = vpop.f32.mrf.mxu1 }
 0x288   : > { %v662_v13 = vpop.f32.mrf.mxu0  ;;  %v705_v4 = vpop.f32.mrf.mxu1 }
 0x289   : > { %v2639_v8 = vpack.c.bf16 %v662_v13, %v658_v7  ;;  %v2669_v14 = vpack.c.bf16 %v705_v4, %v701_v9 }
 0x28a   : > { %v664_v15 = vpop.f32.mrf.mxu0  ;;  %v707_v16 = vpop.f32.mrf.mxu1 }
 0x28b   : > { %2640 = vst [vmem:[#allocation2] sm:$0xff] %v2639_v8   ;;  %2670 = vst [vmem:[#allocation2 + $0x10] sm:$0xff] %v2669_v14   ;;  %v2654_v17 = vpack.c.bf16 %v664_v15, %v660_v10  ;;  %v2684_v18 = vpack.c.bf16 %v707_v16, %v703_v12 }
 0x28d   : > { %2655 = vst [vmem:[#allocation2 + $0x8] sm:$0xff] %v2654_v17   ;;  %2685 = vst [vmem:[#allocation2 + $0x18] sm:$0xff] %v2684_v18  }
 0x2a4   : > { %v936_v19 = vpop.f32.mrf.mxu0  ;;  %v979_v20 = vpop.f32.mrf.mxu1 }
 0x2a6   : > { %v938_v21 = vpop.f32.mrf.mxu0  ;;  %v981_v11 = vpop.f32.mrf.mxu1 }
 0x2a8   : > { %v940_v22 = vpop.f32.mrf.mxu0  ;;  %v983_v23 = vpop.f32.mrf.mxu1 }
 0x2a9   : > { %v2644_v24 = vpack.c.bf16 %v940_v22, %v936_v19  ;;  %v2674_v25 = vpack.c.bf16 %v983_v23, %v979_v20 }
 0x2aa   : > { %v942_v26 = vpop.f32.mrf.mxu0  ;;  %v985_v27 = vpop.f32.mrf.mxu1 }
 0x2ab   : > { %2645 = vst [vmem:[#allocation3] sm:$0xff] %v2644_v24   ;;  %2675 = vst [vmem:[#allocation3 + $0x10] sm:$0xff] %v2674_v25   ;;  %v2659_v28 = vpack.c.bf16 %v942_v26, %v938_v21  ;;  %v2689_v29 = vpack.c.bf16 %v985_v27, %v981_v11 }
 0x2ad   : > { %2660 = vst [vmem:[#allocation3 + $0x8] sm:$0xff] %v2659_v28   ;;  %2690 = vst [vmem:[#allocation3 + $0x18] sm:$0xff] %v2689_v29  }
 0x2c4   : > { %v1214_v30 = vpop.f32.mrf.mxu0  ;;  %v1257_v31 = vpop.f32.mrf.mxu1 }
 0x2c6   : > { %v1216_v32 = vpop.f32.mrf.mxu0  ;;  %v1259_v33 = vpop.f32.mrf.mxu1 }
 0x2c8   : > { %v1218_v34 = vpop.f32.mrf.mxu0  ;;  %v1261_v35 = vpop.f32.mrf.mxu1 }
 0x2c9   : > { %v2649_v37 = vpack.c.bf16 %v1218_v34, %v1214_v30  ;;  %v2679_v38 = vpack.c.bf16 %v1261_v35, %v1257_v31 }
 0x2ca   : > { %v1220_v39 = vpop.f32.mrf.mxu0  ;;  %v1263_v40 = vpop.f32.mrf.mxu1 }
 0x2cb   : > { %2650 = vst [vmem:[#allocation4] sm:$0xff] %v2649_v37   ;;  %2680 = vst [vmem:[#allocation4 + $0x10] sm:$0xff] %v2679_v38   ;;  %v2664_v41 = vpack.c.bf16 %v1220_v39, %v1216_v32  ;;  %v2694_v42 = vpack.c.bf16 %v1263_v40, %v1259_v33 }
 0x2cd   : > { %2665 = vst [vmem:[#allocation4 + $0x8] sm:$0xff] %v2664_v41   ;;  %2695 = vst [vmem:[#allocation4 + $0x18] sm:$0xff] %v2694_v42  }
 0x2ce PF: > { %v3180_v43 = vld [vmem:[#allocation3] sm:$0xff]   ;;  %v3510_v44 = vmov 0.0   ;;  %v3181_v45 = vld [vmem:[#allocation3 + $0x8] sm:$0xff]   ;;  %vm3511_vm4 = vmmov 0   ;;  %s2560_s21 = sshll.u32 %s3480_s30, 3  ;;  %v3182_v47 = vld [vmem:[#allocation3 + $0x10] sm:$0xff]  }
 0x2cf   : > { %2748 = vmatprep.subr.bf16.mxu0 %v3510_v44  ;;  %2754 = vmatprep.subr.bf16.mxu1 %v3510_v44  ;;  %s1396_s22 = sshra.s32 %s2560_s21, 3  ;;  %v3183_v48 = vld [vmem:[#allocation3 + $0x18] sm:$0xff]   ;;  %vm1604_vm5 = vcmask 130048   ;;  %s3980_s6 = sld [smem:[#allocation20_spill]] }
 0x2d0   : > { %2749 = vmatpush3.bf16.xpose.msra.mxu0 %v3180_v43  ;;  %2750 = vmatprep.mubr.msk.bf16.mxu0 %vm3511_vm4, %v3510_v44  ;;  %s2561_s24 = sshll.u32 %s1396_s22, 2  ;;  %s2274_s3 = scalar_lea.vmem %s3735_s12, %s2560_s21 [#allocation5] }
 0x2d1   : > { %2755 = vmatpush3.bf16.xpose.msra.mxu1 %v3181_v45  ;;  %2756 = vmatprep.mubr.msk.bf16.mxu1 %vm3511_vm4, %v3510_v44  ;;  %s1399_s5 = scalar_lea.vmem [#allocation2], %s2561_s24  ;;  %s2294_s14 = sshll.u32 %s368_s15, 4  ;;  %s3879_s14 = int_to_ptr.vmem [resolvable:$true] %s2294_s14 }
 0x2d2   : > { %2760 = vmatprep.subr.bf16.mxu0 %v3510_v44  ;;  %2766 = vmatprep.subr.bf16.mxu1 %v3510_v44  ;;  %v1400_v46 = vld [vmem:[%s1399_s5] sm:$0xf]  ;;  %v1401_v49 = vld [vmem:[%s1399_s5 + $0x8] sm:$0xf]  ;;  %v1402_v50 = vld [vmem:[%s1399_s5 + $0x10] sm:$0xf] }
 0x2d3   : > { %v1403_v51 = vld [vmem:[%s1399_s5 + $0x18] sm:$0xf]  ;;  %v3185_v28 = vld [vmem:[#allocation4] sm:$0xff]   ;;  %v3186_v40 = vld [vmem:[#allocation4 + $0x10] sm:$0xff]   ;;  %s3982_s13 = sld [smem:[#allocation29_spill]]  ;;  %s3368_s21 = scalar_lea.vmem %s3879_s14, 128 }
 0x2d4   : > { %v3184_v27 = vld [vmem:[#allocation4 + $0x8] sm:$0xff]   ;;  %v3187_v35 = vld [vmem:[#allocation4 + $0x18] sm:$0xff]   ;;  %p3369_p1 = scmp.ne.s32.totalorder %s3879_s14, %s3368_s21  ;;  %s3512_s22 = smov [#allocation14]  }
 0x2d5   : > { %s2607_s9 = sshll.u32 %s3980_s6, 1  ;;  %s3372_s24 = sshll.u32 %s3512_s22, 4  ;;  %s3373_s24 = int_to_ptr.vmem [resolvable:$false] %s3372_s24 }
 0x2d6   : > { %s2290_s17 = sadd.s32 %s3480_s30, %s2607_s9  ;;  %s2279_s30 = scalar_lea.sflag [#allocation7], %s366_s8 }
 0x2d7   : > { %2751 = vmatmul.mubr.bf16.vlgmr.msra.gmra.mxu0 %v1400_v46  ;;  %s2608_s7 = sshll.u32 %s2290_s17, 7  ;;  %p3370_p11 = pnand %p3369_p1, %p3623_p6 }
 0x2d8   : > { %2757 = vmatmul.mubr.bf16.vlgmr.msra.gmra.mxu1 %v1401_v49  ;;  %2761 = vmatpush3.bf16.xpose.msra.mxu0 %v3182_v47  ;;  %v3190_v47 = vld [vmem:[#allocation13 + $0x38] sm:$0xff]   ;;  %s3374_s5 = scalar_lea.vmem %s3373_s24, 256  ;;  %p3375_p8 = scmp.lt.s32.totalorder %s3879_s14, %s3373_s24 }
 0x2d9   : > { %2767 = vmatpush3.bf16.xpose.msra.mxu1 %v3183_v48  ;;  %2762 = vmatprep.mubr.msk.bf16.mxu0 %vm3511_vm4, %v3510_v44  ;;  %v3188_v49 = vld [vmem:[#allocation13 + $0x78] sm:$0xff]   ;;  %s3877_s12 = scalar_lea.hbm %s3982_s13, %s2608_s7  ;;  %p3371_p13 = pneg %p3370_p11 }
 0x2da   : > { %2768 = vmatprep.mubr.msk.bf16.mxu1 %vm3511_vm4, %v3510_v44  ;;  %2778 = vmatprep.subr.bf16.mxu1 %v3510_v44  ;;  %p3376_p9 = scmp.lt.s32.totalorder %s3374_s5, %s3368_s21 }
 0x2db   : > { %2772 = vmatprep.subr.bf16.mxu0 %v3510_v44 }
 0x2dc   : > { %p3377_p10 = por %p3376_p9, %p3375_p8 }
 0x2de   : > { %p3378_p0 = pnand %p3377_p10, %p3371_p13 }
 0x2df   : > { %2763 = vmatmul.mubr.bf16.vlgmr.msra.gmra.mxu0 %v1402_v50 }
 0x2e0   : > { %2769 = vmatmul.mubr.bf16.vlgmr.msra.gmra.mxu1 %v1403_v51  ;;  %2774 = vmatprep.mubr.msk.bf16.mxu0 %vm3511_vm4, %v3510_v44  ;;  %v3192_v51 = vld [vmem:[#allocation13 + $0x30] sm:$0xff]  }
 0x2e1   : > { %2780 = vmatprep.mubr.msk.bf16.mxu1 %vm3511_vm4, %v3510_v44  ;;  %2779 = vmatpush3.bf16.msra.mxu1 %v3184_v27  ;;  %v3213_v27 = vld [vmem:[#allocation13 + $0x90] sm:$0xff]  }
 0x2e2   : > { %2773 = vmatpush3.bf16.msra.mxu0 %v3185_v28  ;;  %2790 = vmatprep.subr.bf16.mxu1 %v3510_v44  ;;  %v3214_v28 = vld [vmem:[#allocation13 + $0xd8] sm:$0xff]  }
 0x2e3   : > { %2784 = vmatprep.subr.bf16.mxu0 %v3510_v44 }
 0x397   : > { %v1460_v52 = vpop.f32.mrf.mxu0 }
 0x398   : > { %v1506_v53 = vpop.f32.mrf.mxu1  ;;  %v1605_v36 = vsel %vm1604_vm5, %v1460_v52, -inf }
 0x399   : > { %v1608_v54 = vsel %vm1604_vm5, %v1506_v53, -inf  ;;  %v2752_v55 = vpop.f32.mrf.mxu0 }
 0x39a   : > { %1609 = vmax.xlane.f32.xlu0 %v1608_v54  ;;  %v2758_v56 = vpop.f32.mrf.mxu1  ;;  %v3191_v54 = vld [vmem:[#allocation13 + $0x68] sm:$0xff]   ;;  %v3196_v55 = vld [vmem:[#allocation13 + $0x20] sm:$0xff]  }
 0x39b   : > { %v1463_v57 = vpop.f32.mrf.mxu0  ;;  %v3193_v56 = vld [vmem:[#allocation13 + $0x60] sm:$0xff]  }
 0x39c   : > { %v1509_v58 = vpop.f32.mrf.mxu1  ;;  %v3198_v57 = vld [vmem:[#allocation13 + $0x18] sm:$0xff]  }
 0x39d   : > { %v2753_v59 = vpop.f32.mrf.mxu0  ;;  %v3200_v58 = vld [vmem:[#allocation13 + $0x10] sm:$0xff]  }
 0x39e   : > { %v2759_v60 = vpop.f32.mrf.mxu1  ;;  %1606 = vmax.xlane.f32.xlu0 %v1605_v36  ;;  %v3195_v36 = vld [vmem:[#allocation13 + $0x58] sm:$0xff]   ;;  %v3197_v59 = vld [vmem:[#allocation13 + $0x50] sm:$0xff]  }
 0x39f   : > { %v1552_v61 = vpop.f32.mrf.mxu0  ;;  %v3202_v60 = vld [vmem:[#allocation13 + $0x8] sm:$0xff]  }
 0x3a0   : > { %v1611_v62 = vsel %vm1604_vm5, %v1552_v61, -inf  ;;  %v1598_v63 = vpop.f32.mrf.mxu1 }
 0x3a1   : > { %1612 = vmax.xlane.f32.xlu1 %v1611_v62  ;;  %v2764_v0 = vpop.f32.mrf.mxu0  ;;  %v1614_v1 = vsel %vm1604_vm5, %v1598_v63, -inf  ;;  %v3201_v62 = vld [vmem:[#allocation13 + $0x40] sm:$0xff]  }
 0x3a2   : > { %v2770_v2 = vpop.f32.mrf.mxu1 }
 0x3a3   : > { %v1555_v3 = vpop.f32.mrf.mxu0 }
 0x3a4   : > { %v1601_v5 = vpop.f32.mrf.mxu1 }
 0x3a5   : > { %1615 = vmax.xlane.f32.xlu1 %v1614_v1  ;;  %v2765_v6 = vpop.f32.mrf.mxu0  ;;  %v3204_v1 = vld [vmem:[#allocation13 + $0xb8] sm:$0xff]  }
 0x3a6   : > { %v2771_v7 = vpop.f32.mrf.mxu1 }
 0x3a7   : > { %v3205_v7 = vld [vmem:[#allocation13 + $0xb0] sm:$0xff]  }
 0x423   : > { %v1610_v9 = vpop.xlane.xlu0 %1609 }
 0x424   : > { %v1618_v10 = vsub.f32 %v1506_v53, %v1610_v9  ;;  %v3194_v53 = vld [vmem:[#allocation13 + $0x28] sm:$0xff]   ;;  %v3206_v9 = vld [vmem:[#allocation13 + $0xf8] sm:$0xff]  }
 0x426   : > { %v1623_v12 = vmul.f32 1.442695, %v1618_v10 }
 0x427   : > { %v1607_v13 = vpop.xlane.xlu0 %1606 }
 0x428   : > { %3220 = vpow2.f32 %v1623_v12  ;;  %v1617_v4 = vsub.f32 %v1460_v52, %v1607_v13  ;;  %v3189_v52 = vld [vmem:[#allocation13 + $0x70] sm:$0xff]  }
 0x42a   : > { %v1621_v8 = vmul.f32 1.442695, %v1617_v4  ;;  %v1613_v14 = vpop.xlane.xlu1 %1612 }
 0x42b   : > { %v1619_v15 = vsub.f32 %v1552_v61, %v1613_v14  ;;  %v3199_v61 = vld [vmem:[#allocation13 + $0x48] sm:$0xff]   ;;  %v3208_v14 = vld [vmem:[#allocation13 + $0xf0] sm:$0xff]  }
 0x42c   : > { %3222 = vpow2.f32 %v1621_v8  ;;  %v3207_v8 = vld [vmem:[#allocation13 + $0xa8] sm:$0xff]  }
 0x42d   : > { %v1625_v16 = vmul.f32 1.442695, %v1619_v15 }
 0x42e   : > { %v1616_v17 = vpop.xlane.xlu1 %1615 }
 0x42f   : > { %3224 = vpow2.f32 %v1625_v16  ;;  %v1620_v18 = vsub.f32 %v1598_v63, %v1616_v17  ;;  %v3203_v63 = vld [vmem:[#allocation13] sm:$0xff]  }
 0x431   : > { %v1627_v19 = vmul.f32 1.442695, %v1620_v18  ;;  %v3209_v18 = vld [vmem:[#allocation13 + $0xa0] sm:$0xff]  }
 0x433   : > { %3226 = vpow2.f32 %v1627_v19  ;;  %v3210_v19 = vld [vmem:[#allocation13 + $0xe8] sm:$0xff]  }
 0x435   : > { %v3221_v20 = vpop.eup %3220 }
 0x436   : > { %v1632_v21 = vsel %vm1604_vm5, %v3221_v20, 0.0 }
 0x437   : > { %1633 = vadd.xlane.f32.xlu0 %v1632_v21 }
 0x439   : > { %v3223_v11 = vpop.eup %3222 }
 0x43a   : > { %v1629_v22 = vsel %vm1604_vm5, %v3223_v11, 0.0 }
 0x43b   : > { %1630 = vadd.xlane.f32.xlu1 %v1629_v22 }
 0x43c   : > { %v3225_v23 = vpop.eup %3224 }
 0x43d   : > { %v1635_v24 = vsel %vm1604_vm5, %v3225_v23, 0.0 }
 0x43e   : > { %1636 = vadd.xlane.f32.xlu0 %v1635_v24  ;;  %v3212_v24 = vld [vmem:[#allocation13 + $0xe0] sm:$0xff]  }
 0x440   : > { %v3227_v25 = vpop.eup %3226 }
 0x441   : > { %v1638_v26 = vsel %vm1604_vm5, %v3227_v25, 0.0 }
 0x442   : > { %1639 = vadd.xlane.f32.xlu1 %v1638_v26 }
 0x4c0   : > { %v1634_v29 = vpop.xlane.xlu0 %1633 }
 0x4c1   : > { %3228 = vrcp.f32 %v1634_v29  ;;  %v3215_v29 = vld [vmem:[#allocation13 + $0x88] sm:$0xff]  }
 0x4c4   : > { %v1631_v30 = vpop.xlane.xlu1 %1630 }
 0x4c5   : > { %3230 = vrcp.f32 %v1631_v30  ;;  %v3216_v30 = vld [vmem:[#allocation13 + $0xd0] sm:$0xff]  }
 0x4c7   : > { %v1637_v31 = vpop.xlane.xlu0 %1636 }
 0x4c8   : > { %3232 = vrcp.f32 %v1637_v31  ;;  %v3217_v31 = vld [vmem:[#allocation13 + $0x80] sm:$0xff]  }
 0x4cb   : > { %v1640_v32 = vpop.xlane.xlu1 %1639 }
 0x4cc   : > { %3234 = vrcp.f32 %v1640_v32  ;;  %v3218_v32 = vld [vmem:[#allocation13 + $0xc8] sm:$0xff]  }
 0x4ce   : > { %v3229_v33 = vpop.eup %3228 }
 0x4cf   : > { %v1646_v34 = vmul.f32 %v3229_v33, %v3221_v20  ;;  %v3219_v33 = vld [vmem:[#allocation13 + $0xc0] sm:$0xff]  }
 0x4d1   : > { %v1650_v37 = vpack.c.bf16 %v1646_v34, %v1646_v34 }
 0x4d2   : > { %v3231_v38 = vpop.eup %3230 }
 0x4d3   : > { %2781 = vmatmul.mubr.msk.bf16.vlgmr.msra.gmra.mxu1 %vm1604_vm5, %v1650_v37  ;;  %v1645_v39 = vmul.f32 %v3231_v38, %v3223_v11 }
 0x4d4   : > { %2791 = vmatpush3.bf16.msra.mxu1 %v3187_v35  ;;  %2792 = vmatprep.mubr.msk.bf16.mxu1 %vm3511_vm4, %v3510_v44 }
 0x4d5   : > { %v1649_v41 = vpack.c.bf16 %v1645_v39, %v1645_v39  ;;  %2816 = vmatprep.subr.bf16.mxu1 %v3510_v44  ;;  %v3233_v42 = vpop.eup %3232 }
 0x4d6   : > { %v1647_v45 = vmul.f32 %v3233_v42, %v3225_v23  ;;  %v3211_v23 = vld [vmem:[#allocation13 + $0x98] sm:$0xff]  }
 0x4d7   : > { %2775 = vmatmul.mubr.msk.bf16.vlgmr.msra.gmra.mxu0 %vm1604_vm5, %v1649_v41 }
 0x4d8   : > { %2785 = vmatpush3.bf16.msra.mxu0 %v3186_v40  ;;  %2786 = vmatprep.mubr.msk.bf16.mxu0 %vm3511_vm4, %v3510_v44  ;;  %v1651_v50 = vpack.c.bf16 %v1647_v45, %v1647_v45 }
 0x4d9   : > { %v3235_v43 = vpop.eup %3234  ;;  %2796 = vmatprep.subr.bf16.mxu0 %v3510_v44 }
 0x4da   : > { %v1648_v46 = vmul.f32 %v3235_v43, %v3227_v25 }
 0x4dc   : > { %v1652_v48 = vpack.c.bf16 %v1648_v46, %v1648_v46 }
 0x4de   : > { %2793 = vmatmul.mubr.msk.bf16.vlgmr.msra.gmra.mxu1 %vm1604_vm5, %v1652_v48 }
 0x4df   : > { %2787 = vmatmul.mubr.msk.bf16.vlgmr.msra.gmra.mxu0 %vm1604_vm5, %v1651_v50  ;;  %2817 = vmatpush3.bf16.msra.mxu1 %v3190_v47 }
 0x4e0   : > { %2797 = vmatpush3.bf16.msra.mxu0 %v3188_v49  ;;  %2818 = vmatprep.subr.bf16.mxu1 %v3510_v44 }
 0x4e1   : > { %2798 = vmatprep.subr.bf16.mxu0 %v3510_v44  ;;  %2812 = vmatprep.mubr.msk.bf16.mxu0 %vm3511_vm4, %v3510_v44 }
 0x4e2   : > { %2832 = vmatprep.mubr.msk.bf16.mxu1 %vm3511_vm4, %v3510_v44 }
 0x4e3   : > { %2819 = vmatpush3.bf16.msra.mxu1 %v3192_v51  ;;  %v2275_v51 = vld [vmem:[%s2274_s3] sm:$0xff] }
 0x4e4   : > { %2799 = vmatpush3.bf16.msra.mxu0 %v3189_v52  ;;  %2820 = vmatprep.subr.bf16.mxu1 %v3510_v44 }
 0x4e5   : > { %2800 = vmatprep.subr.bf16.mxu0 %v3510_v44 }
 0x4e7   : > { %2821 = vmatpush3.bf16.msra.mxu1 %v3194_v53 }
 0x4e8   : > { %2801 = vmatpush3.bf16.msra.mxu0 %v3191_v54  ;;  %2822 = vmatprep.subr.bf16.mxu1 %v3510_v44 }
 0x4e9   : > { %2802 = vmatprep.subr.bf16.mxu0 %v3510_v44 }
 0x4eb   : > { %2823 = vmatpush3.bf16.msra.mxu1 %v3196_v55 }
 0x4ec   : > { %2803 = vmatpush3.bf16.msra.mxu0 %v3193_v56  ;;  %2824 = vmatprep.subr.bf16.mxu1 %v3510_v44 }
 0x4ed   : > { %2804 = vmatprep.subr.bf16.mxu0 %v3510_v44 }
 0x4ef   : > { %2825 = vmatpush3.bf16.msra.mxu1 %v3198_v57 }
 0x4f0   : > { %2805 = vmatpush3.bf16.msra.mxu0 %v3195_v36  ;;  %2826 = vmatprep.subr.bf16.mxu1 %v3510_v44 }
 0x4f1   : > { %2806 = vmatprep.subr.bf16.mxu0 %v3510_v44 }
 0x4f3   : > { %2827 = vmatpush3.bf16.msra.mxu1 %v3200_v58 }
 0x4f4   : > { %2807 = vmatpush3.bf16.msra.mxu0 %v3197_v59  ;;  %2828 = vmatprep.subr.bf16.mxu1 %v3510_v44 }
 0x4f5   : > { %2808 = vmatprep.subr.bf16.mxu0 %v3510_v44 }
 0x4f7   : > { %2829 = vmatpush3.bf16.msra.mxu1 %v3202_v60 }
 0x4f8   : > { %2809 = vmatpush3.bf16.msra.mxu0 %v3199_v61  ;;  %2830 = vmatprep.subr.bf16.mxu1 %v3510_v44 }
 0x4f9   : > { %2810 = vmatprep.subr.bf16.mxu0 %v3510_v44 }
 0x4fb   : > { %2831 = vmatpush3.bf16.msra.mxu1 %v3203_v63 }
 0x4fc   : > { %2811 = vmatpush3.bf16.msra.mxu0 %v3201_v62  ;;  %2856 = vmatprep.subr.bf16.mxu1 %v3510_v44 }
 0x4fd   : > { %2836 = vmatprep.subr.bf16.mxu0 %v3510_v44 }
 0x593   : > { %v1745_v0 = vpop.f32.mrf.mxu1 }
 0x594   : > { %v1850_v2 = vpack.c.bf16 %v1745_v0, %v1745_v0 }
 0x595   : > { %v2782_v3 = vpop.f32.mrf.mxu1 }
 0x596   : > { %2813 = vmatmul.mubr.bf16.vlgmr.msra.gmra.mxu0 %v1850_v2 }
 0x597   : > { %2837 = vmatpush3.bf16.msra.mxu0 %v3204_v1  ;;  %v1696_v5 = vpop.f32.mrf.mxu0  ;;  %v1748_v6 = vpop.f32.mrf.mxu1  ;;  %2852 = vmatprep.mubr.msk.bf16.mxu0 %vm3511_vm4, %v3510_v44 }
 0x598   : > { %v1849_v10 = vpack.c.bf16 %v1696_v5, %v1696_v5  ;;  %2838 = vmatprep.subr.bf16.mxu0 %v3510_v44 }
 0x599   : > { %v2776_v12 = vpop.f32.mrf.mxu0  ;;  %v2783_v13 = vpop.f32.mrf.mxu1 }
 0x59a   : > { %2833 = vmatmul.mubr.bf16.vlgmr.msra.gmra.mxu1 %v1849_v10 }
 0x59b   : > { %2839 = vmatpush3.bf16.msra.mxu0 %v3205_v7  ;;  %2857 = vmatpush3.bf16.msra.mxu1 %v3206_v9  ;;  %v1699_v4 = vpop.f32.mrf.mxu0 }
 0x59c   : > { %2840 = vmatprep.subr.bf16.mxu0 %v3510_v44  ;;  %2858 = vmatprep.subr.bf16.mxu1 %v3510_v44 }
 0x59d   : > { %v2777_v15 = vpop.f32.mrf.mxu0  ;;  %2872 = vmatprep.mubr.msk.bf16.mxu1 %vm3511_vm4, %v3510_v44 }
 0x59e   : > { %v1843_v16 = vpop.f32.mrf.mxu1 }
 0x59f   : > { %2841 = vmatpush3.bf16.msra.mxu0 %v3207_v8  ;;  %2859 = vmatpush3.bf16.msra.mxu1 %v3208_v14  ;;  %v1794_v17 = vpop.f32.mrf.mxu0  ;;  %v1852_v35 = vpack.c.bf16 %v1843_v16, %v1843_v16 }
 0x5a0   : > { %v2794_v20 = vpop.f32.mrf.mxu1  ;;  %2842 = vmatprep.subr.bf16.mxu0 %v3510_v44  ;;  %2860 = vmatprep.subr.bf16.mxu1 %v3510_v44  ;;  %v1851_v34 = vpack.c.bf16 %v1794_v17, %v1794_v17 }
 0x5a1   : > { %v2788_v21 = vpop.f32.mrf.mxu0 }
 0x5a2   : > { %v1846_v11 = vpop.f32.mrf.mxu1 }
 0x5a3   : > { %2843 = vmatpush3.bf16.msra.mxu0 %v3209_v18  ;;  %2861 = vmatpush3.bf16.msra.mxu1 %v3210_v19  ;;  %v1797_v22 = vpop.f32.mrf.mxu0 }
 0x5a4   : > { %v2795_v25 = vpop.f32.mrf.mxu1  ;;  %2844 = vmatprep.subr.bf16.mxu0 %v3510_v44  ;;  %2862 = vmatprep.subr.bf16.mxu1 %v3510_v44 }
 0x5a5   : > { %v2789_v26 = vpop.f32.mrf.mxu0 }
 0x5a7   : > { %2845 = vmatpush3.bf16.msra.mxu0 %v3211_v23  ;;  %2863 = vmatpush3.bf16.msra.mxu1 %v3212_v24 }
 0x5a8   : > { %2846 = vmatprep.subr.bf16.mxu0 %v3510_v44  ;;  %2864 = vmatprep.subr.bf16.mxu1 %v3510_v44 }
 0x5ab   : > { %2847 = vmatpush3.bf16.msra.mxu0 %v3213_v27  ;;  %2865 = vmatpush3.bf16.msra.mxu1 %v3214_v28 }
 0x5ac   : > { %2848 = vmatprep.subr.bf16.mxu0 %v3510_v44  ;;  %2866 = vmatprep.subr.bf16.mxu1 %v3510_v44 }
 0x5af   : > { %2849 = vmatpush3.bf16.msra.mxu0 %v3215_v29  ;;  %2867 = vmatpush3.bf16.msra.mxu1 %v3216_v30 }
 0x5b0   : > { %2850 = vmatprep.subr.bf16.mxu0 %v3510_v44  ;;  %2868 = vmatprep.subr.bf16.mxu1 %v3510_v44 }
 0x5b3   : > { %2851 = vmatpush3.bf16.msra.mxu0 %v3217_v31  ;;  %2869 = vmatpush3.bf16.msra.mxu1 %v3218_v32 }
 0x5b4   : > { %2870 = vmatprep.subr.bf16.mxu1 %v3510_v44 }
 0x5b6   : > { %2853 = vmatmul.mubr.bf16.vlgmr.msra.gmra.mxu0 %v1851_v34 }
 0x5b7   : > { %2871 = vmatpush3.bf16.msra.mxu1 %v3219_v33 }
 0x5ba   : > { %2873 = vmatmul.mubr.bf16.vlgmr.msra.gmra.mxu1 %v1852_v35 }
 0x656   : > { %v1968_v37 = vpop.f32.mrf.mxu0 }
 0x658   : > { %v2814_v38 = vpop.f32.mrf.mxu0 }
 0x65a   : > { %v1971_v39 = vpop.f32.mrf.mxu0  ;;  %v2056_v40 = vpop.f32.mrf.mxu1 }
 0x65b   : > { %v2057_v47 = vadd.f32 %v2056_v40, %v1968_v37 }
 0x65c   : > { %v2815_v41 = vpop.f32.mrf.mxu0  ;;  %v2834_v42 = vpop.f32.mrf.mxu1 }
 0x65e   : > { %v2059_v43 = vpop.f32.mrf.mxu1 }
 0x660   : > { %v2835_v45 = vpop.f32.mrf.mxu1 }
 0x676   : > { %v2161_v46 = vpop.f32.mrf.mxu0 }
 0x677   : > { %v2167_v48 = vadd.f32 %v2161_v46, %v2057_v47 }
 0x678   : > { %v2854_v44 = vpop.f32.mrf.mxu0 }
 0x67a   : > { %v2164_v49 = vpop.f32.mrf.mxu0  ;;  %v2267_v50 = vpop.f32.mrf.mxu1 }
 0x67b   : > { %v2273_v52 = vadd.f32 %v2267_v50, %v2167_v48 }
 0x67c   : > { %v2855_v53 = vpop.f32.mrf.mxu0  ;;  %v2874_v54 = vpop.f32.mrf.mxu1 }
 0x67d   : > { %v2276_v55 = vadd.f32 %v2275_v51, %v2273_v52 }
 0x67e   : > { %v2270_v56 = vpop.f32.mrf.mxu1 }
 0x67f   : > { %2277 = vst [vmem:[%s368_s15] sm:$0xff] %v2276_v55 }
 0x680   : > { %v2875_v57 = vpop.f32.mrf.mxu1 }
 0x681   : > { %3381 = shalt.err (!%p3378_p0)
}
 0x682   : > { %s3382_s16 = scalar_lea.hbm %s3877_s12, 128  ;;  %s3386_s6 = scalar_lea.hbm %s3982_s13, 512 }
 0x683   : > { %p3383_p12 = scmp.ne.s32.totalorder %s3877_s12, %s3382_s16  ;;  %p3387_p7 = scmp.lt.s32.totalorder %s3877_s12, %s3982_s13 }
 0x684   : > { %p3388_p3 = scmp.lt.s32.totalorder %s3386_s6, %s3382_s16 }
 0x685   : > { %p3384_p2 = pnand %p3383_p12, %p3623_p6 }
 0x686   : > { %p3389_p4 = por %p3388_p3, %p3387_p7 }
 0x687   : > { %p3385_p5 = pneg %p3384_p2 }
 0x689   : > { %p3390_p1 = pnand %p3389_p4, %p3385_p5 }
 0x68b   : > { %3393 = shalt.err (!%p3390_p1)
}
 0x68c   : > { %2894 = dma.vmem_to_hbm [thread:$0]  (%p3623_p6), %s3879_s14, 128, %s3877_s12, %s2279_s30  }
 0x68d PF: > { %s3983_s17 = sld [smem:[#allocation19_spill]]  ;;  %p2926_p11 = scmp.ge.s32.totalorder %s3496_s11, 2 }
 0x68e   : > { %s3984_s7 = sld [smem:[#allocation23_spill]] }
 0x693   : > { %s2306_s18 = sand.u32 1, %s3983_s17  }
 0x694   : > { %p3985_p13 = scmp.ne.s32.totalorder %s3984_s7, 0  ;;  %s2307_s20 = scalar_lea.sflag [#allocation7], %s2306_s18 }
 0x696   : > { %p2914_p8 = pnand %p2926_p11, %p3985_p13 }
 0x698   : > { %p2915_p9 = pneg %p2914_p8 }
 0x69a   : > { %3451 = dma.done.wait (%p2915_p9), %s2307_s20, 128  }
 0x69b   : > { %3453 = vsyncadd (%p2915_p9), %s2307_s20, 4294967168  ;;  %s25_s11 = sadd.s32 1, %s3496_s11   ;;  %s3986_s23 = smov %s3712_s27 }
 0x69c   : > { %p22_p10 = scmp.ge.s32.totalorder %s25_s11, 6   ;;  %s3987_s30 = sld [smem:[#allocation21_spill]] }
 0x69d   : > { %s3988_s9 = sld [smem:[#allocation24_spill]]  ;;  %s3989_s24 = smov %s3460_s25 }
 0x69e   : > { %s3990_s25 = smov %s3464_s26  ;;  %s3991_s26 = smov %s3715_s4 }
 0x69f   : > { %s3992_s27 = smov %s3472_s28  ;;  %s3993_s28 = smov %s3476_s29 }
 0x6a0   : > { %s3994_s29 = smov %s3986_s23  ;;  %s3995_s8 = smov %s3492_s10 }
 0x6a1   : > { %s3996_s10 = smov %s4002_s19  ;;  %24 = sbr.rel (!%p22_p10) target bundleno = 17 (0x11), region = 127 }
 0x6a6   :  { %2312 = vsyncpa [#allocation6], 1 }
 0x6a7   :  { %2314 = vsyncpa [#allocation6 + $0x1], 1 }
 0x6a8   :  { %2315 = vsyncpa [#allocation9], 1 }
 0x6a9   :  { %2316 = vsyncpa [#allocation12], 1 }
 0x6aa   :  { %2317 = vsyncpa [#allocation7], 1 }
 0x6ab   :  { %2319 = vsyncpa [#allocation7 + $0x1], 1 }

</bundles_post_ra>
